<compile_context>
chip_gen: v5e
topology: v5e:2x2
jax: 0.10.0
libtpu: 0.0.40
codegen_flags: <defaults>
</compile_context>

<pallas_src>
import jax
import jax.numpy as jnp
from jax.experimental import pallas as pl
from jax.experimental.pallas import tpu as pltpu

LEAKY_SLOPE = 0.2
IN_EPS = 1e-5


def _leaky(x):
    return jnp.where(x >= 0, x, LEAKY_SLOPE * x)


def _rup(v, m):
    return ((v + m - 1) // m) * m


# ----------------------------------------------------------------------------
# Fused whole-network kernel (one grid step == one sample, all layers)
# ----------------------------------------------------------------------------
def _make_disc_kernel(strides):
    """strides: static per-layer stride tuple, e.g. (2, 2, 2, 1, 1)."""
    n_layers = len(strides)

    def kernel(*refs):
        x_ref = refs[0]                                   # (L+2, 1) padded input, f32
        w_refs = refs[1:1 + n_layers]
        b_refs = refs[1 + n_layers:1 + 2 * n_layers]
        o_ref = refs[1 + 2 * n_layers]                    # (L_out, 1)
        bufs = refs[2 + 2 * n_layers:]                    # padded-activation VMEM scratch

        # ---- initial layer: Conv1d(1 -> C0, k3, stride, pad=1) + LeakyReLU --------
        # Ci == 1, so the conv is 3 broadcasted multiply-adds on the VPU; the taps are
        # strided reads straight off the padded input block (no im2col in HBM).
        s0 = strides[0]
        lin0 = x_ref.shape[0] - 2
        lout0 = (lin0 - 1) // s0 + 1
        w0 = w_refs[0][...]                               # (3, C0p) f32
        acc = jnp.zeros((lout0, w0.shape[1]), jnp.float32) + b_refs[0][...]
        for t in range(3):
            idx = pl.ds(t, lout0, stride=s0) if s0 > 1 else pl.ds(t, lout0)
            acc = acc + x_ref[idx, :] * w0[t:t + 1, :]    # (lout0,1) * (1,C0p)
        act = _leaky(acc)

        # ---- middle blocks: Conv1d + InstanceNorm1d + LeakyReLU --------------------
        # Previous activation -> padded VMEM scratch; the 3 (strided) taps are read
        # back and lane-concatenated so each conv is ONE bf16 MXU matmul with K=3*Ci.
        for li in range(1, n_layers - 1):
            stride = strides[li]
            w_ref, b_ref, buf = w_refs[li], b_refs[li], bufs[li - 1]
            lin, ci = act.shape
            lout = (lin - 1) // stride + 1
            zrow = jnp.zeros((1, ci), jnp.float32)
            buf[pl.ds(0, 1), :] = zrow                    # zero pad rows (k=3, pad=1)
            buf[pl.ds(lin + 1, 1), :] = zrow
            buf[pl.ds(1, lin), :] = act
            taps = jnp.concatenate(
                [buf[(pl.ds(t, lout, stride=stride) if stride > 1
                      else pl.ds(t, lout)), :] for t in range(3)],
                axis=1)                                   # (lout, 3*ci) f32, lane-aligned
            acc = jnp.dot(taps.astype(jnp.bfloat16), w_ref[...],
                          preferred_element_type=jnp.float32) + b_ref[...]
            # InstanceNorm1d: per (sample, channel) over L, biased var, eps=1e-5, no affine
            mean = jnp.mean(acc, axis=0, keepdims=True)
            var = jnp.mean(jnp.square(acc - mean), axis=0, keepdims=True)
            acc = (acc - mean) * jax.lax.rsqrt(var + IN_EPS)
            act = _leaky(acc)

        # ---- final layer: Conv1d(C -> 1, k3, s1, pad=1) + sigmoid ------------------
        # Co == 1: folded into the epilogue as a VPU multiply + lane reduction instead
        # of a 1-lane MXU matmul; sigmoid divide goes to the EUP via approx reciprocal.
        w_ref, b_ref, buf = w_refs[-1], b_refs[-1], bufs[-1]
        lin, ci = act.shape
        zrow = jnp.zeros((1, ci), jnp.float32)
        buf[pl.ds(0, 1), :] = zrow
        buf[pl.ds(lin + 1, 1), :] = zrow
        buf[pl.ds(1, lin), :] = act
        taps = jnp.concatenate([buf[pl.ds(t, lin), :] for t in range(3)], axis=1)
        logits = jnp.sum(taps * w_ref[...], axis=1, keepdims=True) + b_ref[...]   # (lin, 1)
        o_ref[...] = pl.reciprocal(1.0 + jnp.exp(-logits), approx=True)

    return kernel


# ----------------------------------------------------------------------------
# Wrapper: layout prep + single pallas_call
# ----------------------------------------------------------------------------
def discriminator_forward(x_ncl, params):
    """x_ncl: (N, 1, L) NCL like PyTorch. Returns sigmoid(logits) with shape (N, 1, L_out)."""
    n, cin, length = x_ncl.shape
    assert cin == 1 and params[0][0].shape[1] == 1, "initial layer expects in_channels == 1"
    strides = tuple(int(p[2]) for p in params)
    assert strides[-1] == 1 and params[-1][0].shape[2] == 1, "final layer must be Conv1d(C,1,s=1)"
    n_layers = len(params)

    # per-layer output lengths for k=3, padding=1
    louts, lcur = [], length
    for s in strides:
        lcur = (lcur - 1) // s + 1
        louts.append(lcur)
    l_final = louts[-1]

    # ---- kernel-side parameter layouts (channels zero-padded to multiples of 128) ----
    kw, kb, cpads = [], [], []
    w0, b0 = params[0][0], params[0][1]
    c0 = w0.shape[2]
    c0p = _rup(c0, 128)
    kw.append(jnp.pad(w0[:, 0, :], ((0, 0), (0, c0p - c0))).astype(jnp.float32))       # (3, C0p)
    kb.append(jnp.pad(b0.reshape(1, c0), ((0, 0), (0, c0p - c0))).astype(jnp.float32))
    cpads.append(c0p)
    prev_cp = c0p
    for (w, b, stride, norm) in params[1:-1]:
        k, ci, co = w.shape
        cop = _rup(co, 128)
        wp = jnp.pad(w, ((0, 0), (0, prev_cp - ci), (0, cop - co)))
        kw.append(wp.reshape(k * prev_cp, cop).astype(jnp.bfloat16))                    # (3*Cip, Cop)
        kb.append(jnp.pad(b.reshape(1, co), ((0, 0), (0, cop - co))).astype(jnp.float32))
        cpads.append(cop)
        prev_cp = cop
    wl, bl = params[-1][0], params[-1][1]
    k, ci, co = wl.shape
    wp = jnp.pad(wl, ((0, 0), (0, prev_cp - ci), (0, 0)))
    kw.append(wp.reshape(k * prev_cp, co).T.astype(jnp.float32))                        # (1, 3*Cip)
    kb.append(bl.reshape(1, co).astype(jnp.float32))                                    # (1, 1)

    # ---- input: channels-last + zero pad L by 1 on each side (k=3, padding=1) ----
    x_pad = jnp.pad(jnp.transpose(x_ncl, (0, 2, 1)).astype(jnp.float32),
                    ((0, 0), (1, 1), (0, 0)))                                           # (N, L+2, 1)

    # ---- VMEM scratch: padded activations feeding layers 1..n-1 ----
    scratch = [pltpu.VMEM((_rup(louts[i] + 2, 8), cpads[i]), jnp.float32)
               for i in range(n_layers - 1)]

    in_specs = [pl.BlockSpec((None, length + 2, cin), lambda i: (i, 0, 0))]
    for arr in kw + kb:
        r, c = arr.shape
        in_specs.append(pl.BlockSpec((r, c), lambda i: (0, 0)))

    flops = int(sum(2 * n * lo * a.shape[0] * a.shape[1] for lo, a in zip(louts, kw)))
    transc = int(n * (l_final + sum(p[0].shape[2] for p in params[1:-1])))
    bytes_acc = int(x_pad.size * x_pad.dtype.itemsize
                    + sum(a.size * a.dtype.itemsize for a in kw + kb)
                    + n * l_final * 4)

    out = pl.pallas_call(
        _make_disc_kernel(strides),
        out_shape=jax.ShapeDtypeStruct((n, l_final, 1), jnp.float32),
        grid=(n,),
        in_specs=in_specs,
        out_specs=pl.BlockSpec((None, l_final, 1), lambda i: (i, 0, 0)),
        scratch_shapes=scratch,
        compiler_params=pltpu.CompilerParams(dimension_semantics=("parallel",)),
        cost_estimate=pl.CostEstimate(flops=flops, transcendentals=transc,
                                      bytes_accessed=bytes_acc),
    )(x_pad, *kw, *kb)

    return jnp.transpose(out, (0, 2, 1))   # (N, 1, L_out), NCL like PyTorch


# ----------------------------------------------------------------------------
# Parameters (deterministic synthetic weights) and pure-JAX reference
# ----------------------------------------------------------------------------
def make_params(key, in_channels=1, out_channels=(32, 64, 128, 256)):
    """Each entry: (w[3, Ci, Co], b[Co], stride, has_instance_norm)."""
    cfg = [(in_channels, out_channels[0], 2, False)]       # initial conv + LeakyReLU
    ci = out_channels[0]
    for co in out_channels[1:]:
        cfg.append((ci, co, 1 if co == 256 else 2, True))  # Block: conv + IN + LeakyReLU
        ci = co
    cfg.append((out_channels[-1], 1, 1, False))            # final Conv1d(256, 1); sigmoid at end

    params = []
    for (ci, co, stride, norm) in cfg:
        key, kw_, kb_ = jax.random.split(key, 3)
        scale = 1.0 / jnp.sqrt(jnp.float32(ci * 3))
        w = jax.random.normal(kw_, (3, ci, co), jnp.float32) * scale
        b = jax.random.normal(kb_, (co,), jnp.float32) * 0.01
        params.append((w, b, stride, norm))
    return params


def reference_forward(x_ncl, params):
    y = x_ncl.astype(jnp.float32)
    n_layers = len(params)
    for i, (w, b, stride, norm) in enumerate(params):
        w_oih = jnp.transpose(w, (2, 1, 0))                 # (Co, Ci, 3)
        y = jax.lax.conv_general_dilated(
            y, w_oih, window_strides=(stride,), padding=((1, 1),),
            dimension_numbers=("NCH", "OIH", "NCH")) + b.reshape(1, -1, 1)
        if norm:
            mean = jnp.mean(y, axis=2, keepdims=True)
            var = jnp.mean(jnp.square(y - mean), axis=2, keepdims=True)
            y = (y - mean) * jax.lax.rsqrt(var + IN_EPS)
        if i < n_layers - 1:
            y = jnp.where(y >= 0, y, LEAKY_SLOPE * y)
    return jax.nn.sigmoid(y)


if __name__ == "__main__":
    key = jax.random.PRNGKey(0)
    k_param, k_x = jax.random.split(key)

    params = make_params(k_param)
    x = jax.random.normal(k_x, (2, 1, 64), jnp.float32)     # (batch=2, channels=1, length=64)

    out = jax.block_until_ready(discriminator_forward(x, params))
    ref = jax.block_until_ready(reference_forward(x, params))

    assert out.shape == (2, 1, 8), out.shape
    assert bool(jnp.all(jnp.isfinite(out)))
    # Matmuls run in bf16 (f32 accumulation); tolerance covers bf16 rounding through the
    # 5-layer stack against the pure-f32 reference.
    max_err = float(jnp.max(jnp.abs(out - ref)))
    assert max_err < 2e-2, max_err

    print("KERNEL_OK")
</pallas_src>

<mosaic_0001>
module attributes {stable_mosaic.version = 11 : i64} {
  func.func @kernel(%arg0: i32, %arg1: memref<1x66x1xf32, #tpu.memory_space<vmem>>, %arg2: memref<3x128xf32, #tpu.memory_space<vmem>>, %arg3: memref<384x128xbf16, #tpu.memory_space<vmem>>, %arg4: memref<384x128xbf16, #tpu.memory_space<vmem>>, %arg5: memref<384x256xbf16, #tpu.memory_space<vmem>>, %arg6: memref<1x768xf32, #tpu.memory_space<vmem>>, %arg7: memref<1x128xf32, #tpu.memory_space<vmem>>, %arg8: memref<1x128xf32, #tpu.memory_space<vmem>>, %arg9: memref<1x128xf32, #tpu.memory_space<vmem>>, %arg10: memref<1x256xf32, #tpu.memory_space<vmem>>, %arg11: memref<1x1xf32, #tpu.memory_space<vmem>>, %arg12: memref<1x8x1xf32, #tpu.memory_space<vmem>>, %arg13: memref<40x128xf32, #tpu.memory_space<vmem>>, %arg14: memref<24x128xf32, #tpu.memory_space<vmem>>, %arg15: memref<16x128xf32, #tpu.memory_space<vmem>>, %arg16: memref<16x256xf32, #tpu.memory_space<vmem>>) attributes {dimension_semantics = [#tpu.dimension_semantics<parallel>], iteration_bounds = array<i64: 2>, scalar_prefetch = 0 : i64, scratch_operands = 4 : i64, tpu.core_type = #tpu.core_type<tc>, window_params = [{transform_indices = @transform_0, window_bounds = array<i64: 1, 66, 1>}, {pipeline_mode = #tpu.pipeline_mode<synchronous>, transform_indices = @transform_1, window_bounds = array<i64: 3, 128>}, {pipeline_mode = #tpu.pipeline_mode<synchronous>, transform_indices = @transform_2, window_bounds = array<i64: 384, 128>}, {pipeline_mode = #tpu.pipeline_mode<synchronous>, transform_indices = @transform_3, window_bounds = array<i64: 384, 128>}, {pipeline_mode = #tpu.pipeline_mode<synchronous>, transform_indices = @transform_4, window_bounds = array<i64: 384, 256>}, {pipeline_mode = #tpu.pipeline_mode<synchronous>, transform_indices = @transform_5, window_bounds = array<i64: 1, 768>}, {pipeline_mode = #tpu.pipeline_mode<synchronous>, transform_indices = @transform_6, window_bounds = array<i64: 1, 128>}, {pipeline_mode = #tpu.pipeline_mode<synchronous>, transform_indices = @transform_7, window_bounds = array<i64: 1, 128>}, {pipeline_mode = #tpu.pipeline_mode<synchronous>, transform_indices = @transform_8, window_bounds = array<i64: 1, 128>}, {pipeline_mode = #tpu.pipeline_mode<synchronous>, transform_indices = @transform_9, window_bounds = array<i64: 1, 256>}, {pipeline_mode = #tpu.pipeline_mode<synchronous>, transform_indices = @transform_10, window_bounds = array<i64: 1, 1>}, {transform_indices = @transform_11, window_bounds = array<i64: 1, 8, 1>}]} {
    %c0 = arith.constant 0 : index
    %c0_0 = arith.constant 0 : index
    %0 = vector.load %arg2[%c0, %c0_0] : memref<3x128xf32, #tpu.memory_space<vmem>>, vector<3x128xf32>
    %cst = arith.constant 0.000000e+00 : f32
    %1 = vector.broadcast %cst : f32 to vector<32x128xf32>
    %c0_1 = arith.constant 0 : index
    %c0_2 = arith.constant 0 : index
    %2 = vector.load %arg7[%c0_1, %c0_2] : memref<1x128xf32, #tpu.memory_space<vmem>>, vector<1x128xf32>
    %3 = vector.broadcast %2 : vector<1x128xf32> to vector<32x128xf32>
    %4 = arith.addf %1, %3 : vector<32x128xf32>
    %c0_3 = arith.constant 0 : index
    %c0_4 = arith.constant 0 : index
    %c0_5 = arith.constant 0 : index
    %5 = tpu.strided_load %arg1[%c0_3, %c0_4, %c0_5] {strides = array<i32: 1, 2, 1>} : memref<1x66x1xf32, #tpu.memory_space<vmem>>, vector<1x32x1xf32>
    %6 = vector.shape_cast %5 : vector<1x32x1xf32> to vector<32x1xf32>
    %7 = vector.extract_strided_slice %0 {offsets = [0, 0], sizes = [1, 128], strides = [1, 1]} : vector<3x128xf32> to vector<1x128xf32>
    %8 = vector.broadcast %6 : vector<32x1xf32> to vector<32x128xf32>
    %9 = vector.broadcast %7 : vector<1x128xf32> to vector<32x128xf32>
    %10 = arith.mulf %8, %9 : vector<32x128xf32>
    %11 = arith.addf %4, %10 : vector<32x128xf32>
    %c0_6 = arith.constant 0 : index
    %c1 = arith.constant 1 : index
    %c0_7 = arith.constant 0 : index
    %12 = tpu.strided_load %arg1[%c0_6, %c1, %c0_7] {strides = array<i32: 1, 2, 1>} : memref<1x66x1xf32, #tpu.memory_space<vmem>>, vector<1x32x1xf32>
    %13 = vector.shape_cast %12 : vector<1x32x1xf32> to vector<32x1xf32>
    %14 = vector.extract_strided_slice %0 {offsets = [1, 0], sizes = [1, 128], strides = [1, 1]} : vector<3x128xf32> to vector<1x128xf32>
    %15 = vector.broadcast %13 : vector<32x1xf32> to vector<32x128xf32>
    %16 = vector.broadcast %14 : vector<1x128xf32> to vector<32x128xf32>
    %17 = arith.mulf %15, %16 : vector<32x128xf32>
    %18 = arith.addf %11, %17 : vector<32x128xf32>
    %c0_8 = arith.constant 0 : index
    %c2 = arith.constant 2 : index
    %c0_9 = arith.constant 0 : index
    %19 = tpu.strided_load %arg1[%c0_8, %c2, %c0_9] {strides = array<i32: 1, 2, 1>} : memref<1x66x1xf32, #tpu.memory_space<vmem>>, vector<1x32x1xf32>
    %20 = vector.shape_cast %19 : vector<1x32x1xf32> to vector<32x1xf32>
    %21 = vector.extract_strided_slice %0 {offsets = [2, 0], sizes = [1, 128], strides = [1, 1]} : vector<3x128xf32> to vector<1x128xf32>
    %22 = vector.broadcast %20 : vector<32x1xf32> to vector<32x128xf32>
    %23 = vector.broadcast %21 : vector<1x128xf32> to vector<32x128xf32>
    %24 = arith.mulf %22, %23 : vector<32x128xf32>
    %25 = arith.addf %18, %24 : vector<32x128xf32>
    %cst_10 = arith.constant 0.000000e+00 : f32
    %26 = vector.broadcast %cst_10 : f32 to vector<32x128xf32>
    %27 = arith.cmpf oge, %25, %26 : vector<32x128xf32>
    %cst_11 = arith.constant 2.000000e-01 : f32
    %28 = vector.broadcast %cst_11 : f32 to vector<32x128xf32>
    %29 = arith.mulf %28, %25 : vector<32x128xf32>
    %30 = arith.select %27, %25, %29 : vector<32x128xi1>, vector<32x128xf32>
    %cst_12 = arith.constant 0.000000e+00 : f32
    %31 = vector.broadcast %cst_12 : f32 to vector<1x128xf32>
    %c0_13 = arith.constant 0 : index
    %c0_14 = arith.constant 0 : index
    %32 = vector.load %arg13[%c0_13, %c0_14] : memref<40x128xf32, #tpu.memory_space<vmem>>, vector<1x128xf32>
    tpu.vector_store %arg13[%c0_13, %c0_14], %31 {strides = array<i32>} : memref<40x128xf32, #tpu.memory_space<vmem>>, vector<1x128xf32>,
    %c33 = arith.constant 33 : index
    %c0_15 = arith.constant 0 : index
    %33 = vector.load %arg13[%c33, %c0_15] : memref<40x128xf32, #tpu.memory_space<vmem>>, vector<1x128xf32>
    tpu.vector_store %arg13[%c33, %c0_15], %31 {strides = array<i32>} : memref<40x128xf32, #tpu.memory_space<vmem>>, vector<1x128xf32>,
    %c1_16 = arith.constant 1 : index
    %c0_17 = arith.constant 0 : index
    %34 = vector.load %arg13[%c1_16, %c0_17] : memref<40x128xf32, #tpu.memory_space<vmem>>, vector<32x128xf32>
    tpu.vector_store %arg13[%c1_16, %c0_17], %30 {strides = array<i32>} : memref<40x128xf32, #tpu.memory_space<vmem>>, vector<32x128xf32>,
    %c0_18 = arith.constant 0 : index
    %c0_19 = arith.constant 0 : index
    %35 = tpu.strided_load %arg13[%c0_18, %c0_19] {strides = array<i32: 2, 1>} : memref<40x128xf32, #tpu.memory_space<vmem>>, vector<16x128xf32>
    %c1_20 = arith.constant 1 : index
    %c0_21 = arith.constant 0 : index
    %36 = tpu.strided_load %arg13[%c1_20, %c0_21] {strides = array<i32: 2, 1>} : memref<40x128xf32, #tpu.memory_space<vmem>>, vector<16x128xf32>
    %c2_22 = arith.constant 2 : index
    %c0_23 = arith.constant 0 : index
    %37 = tpu.strided_load %arg13[%c2_22, %c0_23] {strides = array<i32: 2, 1>} : memref<40x128xf32, #tpu.memory_space<vmem>>, vector<16x128xf32>
    %38 = tpu.concatenate %35, %36, %37 in 1 : vector<16x128xf32>, vector<16x128xf32>, vector<16x128xf32> -> vector<16x384xf32>
    %39 = arith.truncf %38 : vector<16x384xf32> to vector<16x384xbf16>
    %c0_24 = arith.constant 0 : index
    %c0_25 = arith.constant 0 : index
    %40 = vector.load %arg3[%c0_24, %c0_25] : memref<384x128xbf16, #tpu.memory_space<vmem>>, vector<384x128xbf16>
    %cst_26 = arith.constant dense<0.000000e+00> : vector<16x128xf32>
    %41 = tpu.matmul %39, %40, %cst_26 {dimension_numbers = #tpu.dot_dimension_numbers<[1], [0], [0], [1], [0, 0, 1, 1], [], []>} : vector<16x384xbf16>, vector<384x128xbf16>, vector<16x128xf32> -> vector<16x128xf32>
    %c0_27 = arith.constant 0 : index
    %c0_28 = arith.constant 0 : index
    %42 = vector.load %arg8[%c0_27, %c0_28] : memref<1x128xf32, #tpu.memory_space<vmem>>, vector<1x128xf32>
    %43 = vector.broadcast %42 : vector<1x128xf32> to vector<16x128xf32>
    %44 = arith.addf %41, %43 : vector<16x128xf32>
    %cst_29 = arith.constant dense<0.000000e+00> : vector<128xf32>
    %45 = vector.multi_reduction <add>, %44, %cst_29 [0] : vector<16x128xf32> to vector<128xf32>
    %46 = vector.shape_cast %45 : vector<128xf32> to vector<1x128xf32>
    %cst_30 = arith.constant 1.600000e+01 : f32
    %47 = vector.broadcast %cst_30 : f32 to vector<1x128xf32>
    %48 = arith.divf %46, %47 : vector<1x128xf32>
    %49 = vector.broadcast %48 : vector<1x128xf32> to vector<16x128xf32>
    %50 = arith.subf %44, %49 : vector<16x128xf32>
    %51 = arith.mulf %50, %50 : vector<16x128xf32>
    %cst_31 = arith.constant dense<0.000000e+00> : vector<128xf32>
    %52 = vector.multi_reduction <add>, %51, %cst_31 [0] : vector<16x128xf32> to vector<128xf32>
    %53 = vector.shape_cast %52 : vector<128xf32> to vector<1x128xf32>
    %cst_32 = arith.constant 1.600000e+01 : f32
    %54 = vector.broadcast %cst_32 : f32 to vector<1x128xf32>
    %55 = arith.divf %53, %54 : vector<1x128xf32>
    %56 = vector.broadcast %48 : vector<1x128xf32> to vector<16x128xf32>
    %57 = arith.subf %44, %56 : vector<16x128xf32>
    %cst_33 = arith.constant 9.99999974E-6 : f32
    %58 = vector.broadcast %cst_33 : f32 to vector<1x128xf32>
    %59 = arith.addf %55, %58 : vector<1x128xf32>
    %60 = math.rsqrt %59 : vector<1x128xf32>
    %61 = vector.broadcast %60 : vector<1x128xf32> to vector<16x128xf32>
    %62 = arith.mulf %57, %61 : vector<16x128xf32>
    %cst_34 = arith.constant 0.000000e+00 : f32
    %63 = vector.broadcast %cst_34 : f32 to vector<16x128xf32>
    %64 = arith.cmpf oge, %62, %63 : vector<16x128xf32>
    %cst_35 = arith.constant 2.000000e-01 : f32
    %65 = vector.broadcast %cst_35 : f32 to vector<16x128xf32>
    %66 = arith.mulf %65, %62 : vector<16x128xf32>
    %67 = arith.select %64, %62, %66 : vector<16x128xi1>, vector<16x128xf32>
    %cst_36 = arith.constant 0.000000e+00 : f32
    %68 = vector.broadcast %cst_36 : f32 to vector<1x128xf32>
    %c0_37 = arith.constant 0 : index
    %c0_38 = arith.constant 0 : index
    %69 = vector.load %arg14[%c0_37, %c0_38] : memref<24x128xf32, #tpu.memory_space<vmem>>, vector<1x128xf32>
    tpu.vector_store %arg14[%c0_37, %c0_38], %68 {strides = array<i32>} : memref<24x128xf32, #tpu.memory_space<vmem>>, vector<1x128xf32>,
    %c17 = arith.constant 17 : index
    %c0_39 = arith.constant 0 : index
    %70 = vector.load %arg14[%c17, %c0_39] : memref<24x128xf32, #tpu.memory_space<vmem>>, vector<1x128xf32>
    tpu.vector_store %arg14[%c17, %c0_39], %68 {strides = array<i32>} : memref<24x128xf32, #tpu.memory_space<vmem>>, vector<1x128xf32>,
    %c1_40 = arith.constant 1 : index
    %c0_41 = arith.constant 0 : index
    %71 = vector.load %arg14[%c1_40, %c0_41] : memref<24x128xf32, #tpu.memory_space<vmem>>, vector<16x128xf32>
    tpu.vector_store %arg14[%c1_40, %c0_41], %67 {strides = array<i32>} : memref<24x128xf32, #tpu.memory_space<vmem>>, vector<16x128xf32>,
    %c0_42 = arith.constant 0 : index
    %c0_43 = arith.constant 0 : index
    %72 = tpu.strided_load %arg14[%c0_42, %c0_43] {strides = array<i32: 2, 1>} : memref<24x128xf32, #tpu.memory_space<vmem>>, vector<8x128xf32>
    %c1_44 = arith.constant 1 : index
    %c0_45 = arith.constant 0 : index
    %73 = tpu.strided_load %arg14[%c1_44, %c0_45] {strides = array<i32: 2, 1>} : memref<24x128xf32, #tpu.memory_space<vmem>>, vector<8x128xf32>
    %c2_46 = arith.constant 2 : index
    %c0_47 = arith.constant 0 : index
    %74 = tpu.strided_load %arg14[%c2_46, %c0_47] {strides = array<i32: 2, 1>} : memref<24x128xf32, #tpu.memory_space<vmem>>, vector<8x128xf32>
    %75 = tpu.concatenate %72, %73, %74 in 1 : vector<8x128xf32>, vector<8x128xf32>, vector<8x128xf32> -> vector<8x384xf32>
    %76 = arith.truncf %75 : vector<8x384xf32> to vector<8x384xbf16>
    %c0_48 = arith.constant 0 : index
    %c0_49 = arith.constant 0 : index
    %77 = vector.load %arg4[%c0_48, %c0_49] : memref<384x128xbf16, #tpu.memory_space<vmem>>, vector<384x128xbf16>
    %cst_50 = arith.constant dense<0.000000e+00> : vector<8x128xf32>
    %78 = tpu.matmul %76, %77, %cst_50 {dimension_numbers = #tpu.dot_dimension_numbers<[1], [0], [0], [1], [0, 0, 1, 1], [], []>} : vector<8x384xbf16>, vector<384x128xbf16>, vector<8x128xf32> -> vector<8x128xf32>
    %c0_51 = arith.constant 0 : index
    %c0_52 = arith.constant 0 : index
    %79 = vector.load %arg9[%c0_51, %c0_52] : memref<1x128xf32, #tpu.memory_space<vmem>>, vector<1x128xf32>
    %80 = vector.broadcast %79 : vector<1x128xf32> to vector<8x128xf32>
    %81 = arith.addf %78, %80 : vector<8x128xf32>
    %cst_53 = arith.constant dense<0.000000e+00> : vector<128xf32>
    %82 = vector.multi_reduction <add>, %81, %cst_53 [0] : vector<8x128xf32> to vector<128xf32>
    %83 = vector.shape_cast %82 : vector<128xf32> to vector<1x128xf32>
    %cst_54 = arith.constant 8.000000e+00 : f32
    %84 = vector.broadcast %cst_54 : f32 to vector<1x128xf32>
    %85 = arith.divf %83, %84 : vector<1x128xf32>
    %86 = vector.broadcast %85 : vector<1x128xf32> to vector<8x128xf32>
    %87 = arith.subf %81, %86 : vector<8x128xf32>
    %88 = arith.mulf %87, %87 : vector<8x128xf32>
    %cst_55 = arith.constant dense<0.000000e+00> : vector<128xf32>
    %89 = vector.multi_reduction <add>, %88, %cst_55 [0] : vector<8x128xf32> to vector<128xf32>
    %90 = vector.shape_cast %89 : vector<128xf32> to vector<1x128xf32>
    %cst_56 = arith.constant 8.000000e+00 : f32
    %91 = vector.broadcast %cst_56 : f32 to vector<1x128xf32>
    %92 = arith.divf %90, %91 : vector<1x128xf32>
    %93 = vector.broadcast %85 : vector<1x128xf32> to vector<8x128xf32>
    %94 = arith.subf %81, %93 : vector<8x128xf32>
    %cst_57 = arith.constant 9.99999974E-6 : f32
    %95 = vector.broadcast %cst_57 : f32 to vector<1x128xf32>
    %96 = arith.addf %92, %95 : vector<1x128xf32>
    %97 = math.rsqrt %96 : vector<1x128xf32>
    %98 = vector.broadcast %97 : vector<1x128xf32> to vector<8x128xf32>
    %99 = arith.mulf %94, %98 : vector<8x128xf32>
    %cst_58 = arith.constant 0.000000e+00 : f32
    %100 = vector.broadcast %cst_58 : f32 to vector<8x128xf32>
    %101 = arith.cmpf oge, %99, %100 : vector<8x128xf32>
    %cst_59 = arith.constant 2.000000e-01 : f32
    %102 = vector.broadcast %cst_59 : f32 to vector<8x128xf32>
    %103 = arith.mulf %102, %99 : vector<8x128xf32>
    %104 = arith.select %101, %99, %103 : vector<8x128xi1>, vector<8x128xf32>
    %cst_60 = arith.constant 0.000000e+00 : f32
    %105 = vector.broadcast %cst_60 : f32 to vector<1x128xf32>
    %c0_61 = arith.constant 0 : index
    %c0_62 = arith.constant 0 : index
    %106 = vector.load %arg15[%c0_61, %c0_62] : memref<16x128xf32, #tpu.memory_space<vmem>>, vector<1x128xf32>
    tpu.vector_store %arg15[%c0_61, %c0_62], %105 {strides = array<i32>} : memref<16x128xf32, #tpu.memory_space<vmem>>, vector<1x128xf32>,
    %c9 = arith.constant 9 : index
    %c0_63 = arith.constant 0 : index
    %107 = vector.load %arg15[%c9, %c0_63] : memref<16x128xf32, #tpu.memory_space<vmem>>, vector<1x128xf32>
    tpu.vector_store %arg15[%c9, %c0_63], %105 {strides = array<i32>} : memref<16x128xf32, #tpu.memory_space<vmem>>, vector<1x128xf32>,
    %c1_64 = arith.constant 1 : index
    %c0_65 = arith.constant 0 : index
    %108 = vector.load %arg15[%c1_64, %c0_65] : memref<16x128xf32, #tpu.memory_space<vmem>>, vector<8x128xf32>
    tpu.vector_store %arg15[%c1_64, %c0_65], %104 {strides = array<i32>} : memref<16x128xf32, #tpu.memory_space<vmem>>, vector<8x128xf32>,
    %c0_66 = arith.constant 0 : index
    %c0_67 = arith.constant 0 : index
    %109 = vector.load %arg15[%c0_66, %c0_67] : memref<16x128xf32, #tpu.memory_space<vmem>>, vector<8x128xf32>
    %c1_68 = arith.constant 1 : index
    %c0_69 = arith.constant 0 : index
    %110 = vector.load %arg15[%c1_68, %c0_69] : memref<16x128xf32, #tpu.memory_space<vmem>>, vector<8x128xf32>
    %c2_70 = arith.constant 2 : index
    %c0_71 = arith.constant 0 : index
    %111 = vector.load %arg15[%c2_70, %c0_71] : memref<16x128xf32, #tpu.memory_space<vmem>>, vector<8x128xf32>
    %112 = tpu.concatenate %109, %110, %111 in 1 : vector<8x128xf32>, vector<8x128xf32>, vector<8x128xf32> -> vector<8x384xf32>
    %113 = arith.truncf %112 : vector<8x384xf32> to vector<8x384xbf16>
    %c0_72 = arith.constant 0 : index
    %c0_73 = arith.constant 0 : index
    %114 = vector.load %arg5[%c0_72, %c0_73] : memref<384x256xbf16, #tpu.memory_space<vmem>>, vector<384x256xbf16>
    %cst_74 = arith.constant dense<0.000000e+00> : vector<8x256xf32>
    %115 = tpu.matmul %113, %114, %cst_74 {dimension_numbers = #tpu.dot_dimension_numbers<[1], [0], [0], [1], [0, 0, 1, 1], [], []>} : vector<8x384xbf16>, vector<384x256xbf16>, vector<8x256xf32> -> vector<8x256xf32>
    %c0_75 = arith.constant 0 : index
    %c0_76 = arith.constant 0 : index
    %116 = vector.load %arg10[%c0_75, %c0_76] : memref<1x256xf32, #tpu.memory_space<vmem>>, vector<1x256xf32>
    %117 = vector.broadcast %116 : vector<1x256xf32> to vector<8x256xf32>
    %118 = arith.addf %115, %117 : vector<8x256xf32>
    %cst_77 = arith.constant dense<0.000000e+00> : vector<256xf32>
    %119 = vector.multi_reduction <add>, %118, %cst_77 [0] : vector<8x256xf32> to vector<256xf32>
    %120 = vector.shape_cast %119 : vector<256xf32> to vector<1x256xf32>
    %cst_78 = arith.constant 8.000000e+00 : f32
    %121 = vector.broadcast %cst_78 : f32 to vector<1x256xf32>
    %122 = arith.divf %120, %121 : vector<1x256xf32>
    %123 = vector.broadcast %122 : vector<1x256xf32> to vector<8x256xf32>
    %124 = arith.subf %118, %123 : vector<8x256xf32>
    %125 = arith.mulf %124, %124 : vector<8x256xf32>
    %cst_79 = arith.constant dense<0.000000e+00> : vector<256xf32>
    %126 = vector.multi_reduction <add>, %125, %cst_79 [0] : vector<8x256xf32> to vector<256xf32>
    %127 = vector.shape_cast %126 : vector<256xf32> to vector<1x256xf32>
    %cst_80 = arith.constant 8.000000e+00 : f32
    %128 = vector.broadcast %cst_80 : f32 to vector<1x256xf32>
    %129 = arith.divf %127, %128 : vector<1x256xf32>
    %130 = vector.broadcast %122 : vector<1x256xf32> to vector<8x256xf32>
    %131 = arith.subf %118, %130 : vector<8x256xf32>
    %cst_81 = arith.constant 9.99999974E-6 : f32
    %132 = vector.broadcast %cst_81 : f32 to vector<1x256xf32>
    %133 = arith.addf %129, %132 : vector<1x256xf32>
    %134 = math.rsqrt %133 : vector<1x256xf32>
    %135 = vector.broadcast %134 : vector<1x256xf32> to vector<8x256xf32>
    %136 = arith.mulf %131, %135 : vector<8x256xf32>
    %cst_82 = arith.constant 0.000000e+00 : f32
    %137 = vector.broadcast %cst_82 : f32 to vector<8x256xf32>
    %138 = arith.cmpf oge, %136, %137 : vector<8x256xf32>
    %cst_83 = arith.constant 2.000000e-01 : f32
    %139 = vector.broadcast %cst_83 : f32 to vector<8x256xf32>
    %140 = arith.mulf %139, %136 : vector<8x256xf32>
    %141 = arith.select %138, %136, %140 : vector<8x256xi1>, vector<8x256xf32>
    %cst_84 = arith.constant 0.000000e+00 : f32
    %142 = vector.broadcast %cst_84 : f32 to vector<1x256xf32>
    %c0_85 = arith.constant 0 : index
    %c0_86 = arith.constant 0 : index
    %143 = vector.load %arg16[%c0_85, %c0_86] : memref<16x256xf32, #tpu.memory_space<vmem>>, vector<1x256xf32>
    tpu.vector_store %arg16[%c0_85, %c0_86], %142 {strides = array<i32>} : memref<16x256xf32, #tpu.memory_space<vmem>>, vector<1x256xf32>,
    %c9_87 = arith.constant 9 : index
    %c0_88 = arith.constant 0 : index
    %144 = vector.load %arg16[%c9_87, %c0_88] : memref<16x256xf32, #tpu.memory_space<vmem>>, vector<1x256xf32>
    tpu.vector_store %arg16[%c9_87, %c0_88], %142 {strides = array<i32>} : memref<16x256xf32, #tpu.memory_space<vmem>>, vector<1x256xf32>,
    %c1_89 = arith.constant 1 : index
    %c0_90 = arith.constant 0 : index
    %145 = vector.load %arg16[%c1_89, %c0_90] : memref<16x256xf32, #tpu.memory_space<vmem>>, vector<8x256xf32>
    tpu.vector_store %arg16[%c1_89, %c0_90], %141 {strides = array<i32>} : memref<16x256xf32, #tpu.memory_space<vmem>>, vector<8x256xf32>,
    %c0_91 = arith.constant 0 : index
    %c0_92 = arith.constant 0 : index
    %146 = vector.load %arg16[%c0_91, %c0_92] : memref<16x256xf32, #tpu.memory_space<vmem>>, vector<8x256xf32>
    %c1_93 = arith.constant 1 : index
    %c0_94 = arith.constant 0 : index
    %147 = vector.load %arg16[%c1_93, %c0_94] : memref<16x256xf32, #tpu.memory_space<vmem>>, vector<8x256xf32>
    %c2_95 = arith.constant 2 : index
    %c0_96 = arith.constant 0 : index
    %148 = vector.load %arg16[%c2_95, %c0_96] : memref<16x256xf32, #tpu.memory_space<vmem>>, vector<8x256xf32>
    %149 = tpu.concatenate %146, %147, %148 in 1 : vector<8x256xf32>, vector<8x256xf32>, vector<8x256xf32> -> vector<8x768xf32>
    %c0_97 = arith.constant 0 : index
    %c0_98 = arith.constant 0 : index
    %150 = vector.load %arg6[%c0_97, %c0_98] : memref<1x768xf32, #tpu.memory_space<vmem>>, vector<1x768xf32>
    %151 = vector.broadcast %150 : vector<1x768xf32> to vector<8x768xf32>
    %152 = arith.mulf %149, %151 : vector<8x768xf32>
    %cst_99 = arith.constant dense<0.000000e+00> : vector<8xf32>
    %153 = vector.multi_reduction <add>, %152, %cst_99 [1] : vector<8x768xf32> to vector<8xf32>
    %154 = vector.shape_cast %153 : vector<8xf32> to vector<8x1xf32>
    %c0_100 = arith.constant 0 : index
    %c0_101 = arith.constant 0 : index
    %155 = vector.load %arg11[%c0_100, %c0_101] : memref<1x1xf32, #tpu.memory_space<vmem>>, vector<1x1xf32>
    %156 = vector.broadcast %155 : vector<1x1xf32> to vector<8x1xf32>
    %157 = arith.addf %154, %156 : vector<8x1xf32>
    %cst_102 = arith.constant 0.000000e+00 : f32
    %158 = vector.broadcast %cst_102 : f32 to vector<8x1xf32>
    %159 = arith.subf %158, %157 : vector<8x1xf32>
    %160 = math.exp %159 : vector<8x1xf32>
    %cst_103 = arith.constant 1.000000e+00 : f32
    %161 = vector.broadcast %cst_103 : f32 to vector<8x1xf32>
    %162 = arith.addf %161, %160 : vector<8x1xf32>
    %163 = tpu.reciprocal %162 {approx = true} : vector<8x1xf32> -> vector<8x1xf32>
    %c0_104 = arith.constant 0 : index
    %c0_105 = arith.constant 0 : index
    %c0_106 = arith.constant 0 : index
    %164 = vector.load %arg12[%c0_104, %c0_105, %c0_106] : memref<1x8x1xf32, #tpu.memory_space<vmem>>, vector<1x8x1xf32>
    %165 = vector.shape_cast %164 : vector<1x8x1xf32> to vector<8x1xf32>
    %166 = vector.shape_cast %163 : vector<8x1xf32> to vector<1x8x1xf32>
    tpu.vector_store %arg12[%c0_104, %c0_105, %c0_106], %166 {strides = array<i32>} : memref<1x8x1xf32, #tpu.memory_space<vmem>>, vector<1x8x1xf32>,
    return
  }
  func.func @transform_0(%arg0: i32) -> (i32, i32, i32) {
    %c0_i32 = arith.constant 0 : i32
    %c0_i32_0 = arith.constant 0 : i32
    %c0_i32_1 = arith.constant 0 : i32
    return %arg0, %c0_i32, %c0_i32_0 : i32, i32, i32
  }
  func.func @transform_1(%arg0: i32) -> (i32, i32) {
    %c0_i32 = arith.constant 0 : i32
    %c0_i32_0 = arith.constant 0 : i32
    %c0_i32_1 = arith.constant 0 : i32
    return %c0_i32, %c0_i32_0 : i32, i32
  }
  func.func @transform_2(%arg0: i32) -> (i32, i32) {
    %c0_i32 = arith.constant 0 : i32
    %c0_i32_0 = arith.constant 0 : i32
    %c0_i32_1 = arith.constant 0 : i32
    return %c0_i32, %c0_i32_0 : i32, i32
  }
  func.func @transform_3(%arg0: i32) -> (i32, i32) {
    %c0_i32 = arith.constant 0 : i32
    %c0_i32_0 = arith.constant 0 : i32
    %c0_i32_1 = arith.constant 0 : i32
    return %c0_i32, %c0_i32_0 : i32, i32
  }
  func.func @transform_4(%arg0: i32) -> (i32, i32) {
    %c0_i32 = arith.constant 0 : i32
    %c0_i32_0 = arith.constant 0 : i32
    %c0_i32_1 = arith.constant 0 : i32
    return %c0_i32, %c0_i32_0 : i32, i32
  }
  func.func @transform_5(%arg0: i32) -> (i32, i32) {
    %c0_i32 = arith.constant 0 : i32
    %c0_i32_0 = arith.constant 0 : i32
    %c0_i32_1 = arith.constant 0 : i32
    return %c0_i32, %c0_i32_0 : i32, i32
  }
  func.func @transform_6(%arg0: i32) -> (i32, i32) {
    %c0_i32 = arith.constant 0 : i32
    %c0_i32_0 = arith.constant 0 : i32
    %c0_i32_1 = arith.constant 0 : i32
    return %c0_i32, %c0_i32_0 : i32, i32
  }
  func.func @transform_7(%arg0: i32) -> (i32, i32) {
    %c0_i32 = arith.constant 0 : i32
    %c0_i32_0 = arith.constant 0 : i32
    %c0_i32_1 = arith.constant 0 : i32
    return %c0_i32, %c0_i32_0 : i32, i32
  }
  func.func @transform_8(%arg0: i32) -> (i32, i32) {
    %c0_i32 = arith.constant 0 : i32
    %c0_i32_0 = arith.constant 0 : i32
    %c0_i32_1 = arith.constant 0 : i32
    return %c0_i32, %c0_i32_0 : i32, i32
  }
  func.func @transform_9(%arg0: i32) -> (i32, i32) {
    %c0_i32 = arith.constant 0 : i32
    %c0_i32_0 = arith.constant 0 : i32
    %c0_i32_1 = arith.constant 0 : i32
    return %c0_i32, %c0_i32_0 : i32, i32
  }
  func.func @transform_10(%arg0: i32) -> (i32, i32) {
    %c0_i32 = arith.constant 0 : i32
    %c0_i32_0 = arith.constant 0 : i32
    %c0_i32_1 = arith.constant 0 : i32
    return %c0_i32, %c0_i32_0 : i32, i32
  }
  func.func @transform_11(%arg0: i32) -> (i32, i32, i32) {
    %c0_i32 = arith.constant 0 : i32
    %c0_i32_0 = arith.constant 0 : i32
    %c0_i32_1 = arith.constant 0 : i32
    return %arg0, %c0_i32, %c0_i32_0 : i32, i32, i32
  }
}

</mosaic_0001>

<bundles_post_ra>
// kernel: tpu_custom_call.1
= control target key start
LH: loop header
LB: loop body
LE: loop exit
PB: predicated region body
PF: predicated region fallthrough
CT: control target
= control target key end

     0   :  { %s2648_s0 = inlined_call_operand.vmem [shape: f32[2,66,1], index: 0, kind: input, shape index: {}]   ;;  %s2649_s1 = inlined_call_operand.vmem [shape: f32[3,128], index: 1, kind: input, shape index: {}]   ;;  %s2650_s2 = inlined_call_operand.hbm [shape: bf16[384,128], index: 2, kind: input, shape index: {}]   ;;  %s2651_s3 = inlined_call_operand.hbm [shape: bf16[384,128], index: 3, kind: input, shape index: {}]   ;;  %s2652_s4 = inlined_call_operand.hbm [shape: bf16[384,256], index: 4, kind: input, shape index: {}]   ;;  %s2653_s5 = inlined_call_operand.vmem [shape: f32[1,768], index: 5, kind: input, shape index: {}]   ;;  %s2654_s6 = inlined_call_operand.vmem [shape: f32[1,128], index: 6, kind: input, shape index: {}]   ;;  %s2655_s7 = inlined_call_operand.vmem [shape: f32[1,128], index: 7, kind: input, shape index: {}]   ;;  %s2656_s8 = inlined_call_operand.vmem [shape: f32[1,128], index: 8, kind: input, shape index: {}]   ;;  %s2657_s9 = inlined_call_operand.vmem [shape: f32[1,256], index: 9, kind: input, shape index: {}]   ;;  %s2658_s10 = inlined_call_operand.<no memory space> [shape: f32[1,1], index: 10, kind: input, shape index: {}]   ;;  %s2659_s11 = inlined_call_operand.vmem [shape: f32[2,8,1], index: 11, kind: output, shape index: {}]  }
   0x1   :  { %v16_v0 = vstv %s2658_s10 }
   0x2   :  { %17 = vst [vmem:[#allocation6] sm:$0x1] %v16_v0 }
   0x3   :  { %18 = vsyncpa [#allocation8], 0 }
   0x4   :  { %19 = vsyncpa [#allocation10], 0  ;;  %s2532_s19 = smov 0  }
   0x5 LB: > { %s2538_s20 = sadd.s32 4294967295, %s2456_s19   ;;  %p1777_p0 = scmp.ge.s32.totalorder %s2456_s19, 1  ;;  %s2456_s19 = sphi %s2532_s19, %s25_s19  }
   0x6   : > { %p292_p1 = scmp.lt.s32.totalorder %s2456_s19, 3  ;;  %p2304_p2 = scmp.eq.s32.totalorder %s2538_s20, 0 }
   0x7   : > { %s320_s22 = sshll.u32 %s2651_s3, 4  ;;  %s306_s26 = sshll.u32 %s2650_s2, 4  ;;  %s321_s22 = int_to_ptr.hbm [resolvable:$true] %s320_s22  ;;  %s307_s26 = int_to_ptr.hbm [resolvable:$true] %s306_s26 }
   0x8   : > { %p2546_p3 = pnand %p1777_p0, %p292_p1  ;;  %s2458_s27 = smov [#allocation9]  }
   0x9   : > { %s322_s28 = sshll.u32 %s2458_s27, 4  ;;  %s2459_s30 = smov [#allocation7]   ;;  %s323_s28 = int_to_ptr.vmem [resolvable:$true] %s322_s28 }
   0xa   : > { %p2294_p4 = pneg %p2546_p3  ;;  %s308_s12 = sshll.u32 %s2459_s30, 4  ;;  %s309_s12 = int_to_ptr.vmem [resolvable:$true] %s308_s12 }
   0xb   : > { %s334_s15 = sshll.u32 %s2652_s4, 4  ;;  %s2460_s16 = smov 64   ;;  %s335_s15 = int_to_ptr.hbm [resolvable:$true] %s334_s15 }
   0xc   : > { %p2557_p5 = pnand %p2304_p2, %p2294_p4  ;;  %s2461_s17 = smov 4  }
   0xd   : > { %s2462_s18 = smov [#allocation11]   ;;  %s2463_s21 = smov 128  }
   0xe   : > { %2300 = dma.hbm_to_vmem [thread:$0]  (!%p2557_p5), %s321_s22, 3072, %s323_s28, [#allocation10], %s2460_s16, %s2460_s16, %s2461_s17  }
   0xf   : > { %2297 = dma.hbm_to_vmem [thread:$0]  (!%p2557_p5), %s307_s26, 3072, %s309_s12, [#allocation8], %s2460_s16, %s2460_s16, %s2461_s17  }
  0x10   : > { %s336_s10 = sshll.u32 %s2462_s18, 4  ;;  %s2464_s24 = smov 8   ;;  %s337_s10 = int_to_ptr.vmem [resolvable:$true] %s336_s10 }
  0x11   : > { %2303 = dma.hbm_to_vmem [thread:$0]  (!%p2557_p5), %s335_s15, 6144, %s337_s10, [#allocation10], %s2463_s21, %s2463_s21, %s2464_s24  }
  0x12   : > { %378 = sbr.rel (%p2546_p3) target bundleno = 980 (0x3d4), region = 64 }
  0x17   : > { %2447 = dma.done.wait (%p2304_p2), [#allocation8], 3072  }
  0x18   : > { %2449 = vsyncadd (%p2304_p2), [#allocation8], 4294964224 }
  0x19   : > { %2451 = dma.done.wait (%p2304_p2), [#allocation10], 9216  }
  0x1a   : > { %2453 = vsyncadd (%p2304_p2), [#allocation10], 4294958080  ;;  %p428_p6 = scmp.lt.s32.totalorder %s2538_s20, 1  ;;  %v2465_v1 = vmov 0   ;;  %v2192_v14 = vld [vmem:[#allocation7 + $0x38] sm:$0xff]  ;;  %v2191_v17 = vld [vmem:[#allocation7 + $0x30] sm:$0xff] }
  0x1b   : > { %2331 = vset.pattern.permute.xlu2 %v2465_v1  ;;  %2330 = vset.pattern.permute.xlu1 %v2465_v1  ;;  %v2200_v15 = vld [vmem:[#allocation7 + $0x78] sm:$0xff]  ;;  %v2199_v18 = vld [vmem:[#allocation7 + $0x70] sm:$0xff]  ;;  %v2190_v21 = vld [vmem:[#allocation7 + $0x28] sm:$0xff]  ;;  %v2466_v43 = vmov 0.0  }
  0x1c   : > { %2329 = vset.pattern.permute.xlu0 %v2465_v1  ;;  %s2663_s20 = smov (!%p428_p6, %s2538_s20), 1  ;;  %v2208_v16 = vld [vmem:[#allocation7 + $0xb8] sm:$0xff]  ;;  %781 = vmatpush.bf16.msra.mxu0 %v2192_v14  ;;  %v2207_v19 = vld [vmem:[#allocation7 + $0xb0] sm:$0xff]  ;;  %v2198_v22 = vld [vmem:[#allocation7 + $0x68] sm:$0xff]  ;;  %565 = vst [vmem:[#allocation2] sm:$0x1] %v2466_v43 }
  0x1d   : > { %s2281_s22 = smul.u32 72, %s2663_s20  ;;  %795 = vmatpush.bf16.msra.mxu1 %v2200_v15  ;;  %809 = vmatpush.bf16.msra.mxu2 %v2208_v16  ;;  %v2206_v23 = vld [vmem:[#allocation7 + $0xa8] sm:$0xff]  ;;  %v2189_v24 = vld [vmem:[#allocation7 + $0x20] sm:$0xff]  ;;  %v2188_v27 = vld [vmem:[#allocation7 + $0x18] sm:$0xff]  ;;  %869 = vst [vmem:[#allocation3] sm:$0x1] %v2466_v43 }
  0x1e   : > { %v2197_v25 = vld [vmem:[#allocation7 + $0x60] sm:$0xff]  ;;  %v2196_v28 = vld [vmem:[#allocation7 + $0x58] sm:$0xff]  ;;  %v437_v30 = vld [vmem:[%s2649_s1] sm:$0x7]  ;;  %1154 = vst [vmem:[#allocation4] sm:$0x1] %v2466_v43 }
  0x1f   : > { %s432_s26 = scalar_lea.vmem %s2648_s0, %s2281_s22  ;;  %v2205_v26 = vld [vmem:[#allocation7 + $0xa0] sm:$0xff]  ;;  %v2204_v29 = vld [vmem:[#allocation7 + $0x98] sm:$0xff]  ;;  %v470_v32 = vperm.slane %v437_v30, 0  ;;  %v2187_v33 = vld [vmem:[#allocation7 + $0x10] sm:$0xff]  ;;  %v507_v36 = vperm.slane %v437_v30, 1  ;;  %v544_v44 = vperm.slane %v437_v30, 2 }
  0x20   : > { %v1791_v2 = vld [vmem:[%s432_s26 + $0x1] ss:$2 sm:$0xff]  ;;  %v1789_v3 = vld [vmem:[%s432_s26 + $0x20] ss:$2 sm:$0xff]  ;;  %v1792_v5 = vld [vmem:[%s432_s26 + $0x11] ss:$2 sm:$0xff]  ;;  %782 = vmatpush.bf16.msra.mxu0 %v2191_v17 }
  0x21   : > { %v443_v4 = vld [vmem:[%s432_s26] ss:$2 sm:$0xff]  ;;  %489 = vperm.xlu2 %2331, %v1791_v2   ;;  %462 = vperm.xlu1 %2330, %v1789_v3   ;;  %v1790_v6 = vld [vmem:[%s432_s26 + $0x30] ss:$2 sm:$0xff]  ;;  %v1794_v9 = vld [vmem:[%s432_s26 + $0x31] ss:$2 sm:$0xff] }
  0x22   : > { %452 = vperm.xlu0 %2329, %v443_v4   ;;  %v1788_v7 = vld [vmem:[%s432_s26 + $0x10] ss:$2 sm:$0xff]  ;;  %v1793_v10 = vld [vmem:[%s432_s26 + $0x21] ss:$2 sm:$0xff]  ;;  %796 = vmatpush.bf16.msra.mxu1 %v2199_v18  ;;  %v2332_v38 = vld [vmem:[%s2654_s6] ss:$0 sm:$0xff] }
  0x23   : > { %v1795_v8 = vld [vmem:[%s432_s26 + $0x2] ss:$2 sm:$0xff]  ;;  %v1798_v11 = vld [vmem:[%s432_s26 + $0x32] ss:$2 sm:$0xff]  ;;  %810 = vmatpush.bf16.msra.mxu2 %v2207_v19  ;;  %1155 = vst [vmem:[#allocation4 + $0x9] sm:$0x1] %v2466_v43 }
  0x24   : > { %v1797_v12 = vld [vmem:[%s432_s26 + $0x22] ss:$2 sm:$0xff]  ;;  %v1796_v13 = vld [vmem:[%s432_s26 + $0x12] ss:$2 sm:$0xff]  ;;  %783 = vmatpush.bf16.msra.mxu0 %v2190_v21  ;;  %s1787_s21 = sshll.u32 %s2663_s20, 3 }
  0x25   : > { %v2195_v34 = vld [vmem:[#allocation7 + $0x50] sm:$0xff]  ;;  %v2186_v40 = vld [vmem:[#allocation7 + $0x8] sm:$0xff]  ;;  %v2185_v48 = vld [vmem:[#allocation7] sm:$0xff]  ;;  %s436_s23 = scalar_lea.vmem %s2659_s11, %s1787_s21 }
  0x26   : > { %797 = vmatpush.bf16.msra.mxu1 %v2198_v22  ;;  %v2203_v35 = vld [vmem:[#allocation7 + $0x90] sm:$0xff]  ;;  %v2194_v41 = vld [vmem:[#allocation7 + $0x48] sm:$0xff]  ;;  %v2193_v49 = vld [vmem:[#allocation7 + $0x40] sm:$0xff] }
  0x27   : > { %811 = vmatpush.bf16.msra.mxu2 %v2206_v23  ;;  %v2202_v42 = vld [vmem:[#allocation7 + $0x88] sm:$0xff]  ;;  %v2201_v51 = vld [vmem:[#allocation7 + $0x80] sm:$0xff] }
  0x28   : > { %784 = vmatpush.bf16.msra.mxu0 %v2189_v24 }
  0x29   : > { %494 = vperm.xlu2 %2331, %v1792_v5   ;;  %467 = vperm.xlu1 %2330, %v1790_v6  }
  0x2a   : > { %457 = vperm.xlu0 %2329, %v1788_v7   ;;  %798 = vmatpush.bf16.msra.mxu1 %v2197_v25 }
  0x2b   : > { %812 = vmatpush.bf16.msra.mxu2 %v2205_v26 }
  0x2c   : > { %785 = vmatpush.bf16.msra.mxu0 %v2188_v27 }
  0x2e   : > { %799 = vmatpush.bf16.msra.mxu1 %v2196_v28 }
  0x2f   : > { %813 = vmatpush.bf16.msra.mxu2 %v2204_v29 }
  0x30   : > { %786 = vmatpush.bf16.msra.mxu0 %v2187_v33 }
  0x31   : > { %526 = vperm.xlu2 %2331, %v1795_v8   ;;  %504 = vperm.xlu1 %2330, %v1794_v9  }
  0x32   : > { %499 = vperm.xlu0 %2329, %v1793_v10   ;;  %800 = vmatpush.bf16.msra.mxu1 %v2195_v34 }
  0x33   : > { %814 = vmatpush.bf16.msra.mxu2 %v2203_v35  ;;  %v2467_v35 = vmov 16.0  }
  0x34   : > { %787 = vmatpush.bf16.msra.mxu0 %v2186_v40  ;;  %2336 = vrcp.f32 %v2467_v35 }
  0x36   : > { %801 = vmatpush.bf16.msra.mxu1 %v2194_v41 }
  0x37   : > { %815 = vmatpush.bf16.msra.mxu2 %v2202_v42 }
  0x38   : > { %788 = vmatpush.bf16.msra.mxu0 %v2185_v48 }
  0x39   : > { %541 = vperm.xlu2 %2331, %v1798_v11   ;;  %536 = vperm.xlu1 %2330, %v1797_v12  }
  0x3a   : > { %531 = vperm.xlu0 %2329, %v1796_v13   ;;  %802 = vmatpush.bf16.msra.mxu1 %v2193_v49 }
  0x3b   : > { %816 = vmatpush.bf16.msra.mxu2 %v2201_v51 }
  0x7b   : > { %v490_v20 = vpop.permute.xlu2 %489 }
  0x7c   : > { %v508_v46 = vmul.f32 %v507_v36, %v490_v20 }
  0x83   : > { %v495_v31 = vpop.permute.xlu2 %494 }
  0x84   : > { %v509_v10 = vmul.f32 %v507_v36, %v495_v31 }
  0x8b   : > { %v527_v50 = vpop.permute.xlu2 %526 }
  0x8c   : > { %v545_v52 = vmul.f32 %v544_v44, %v527_v50 }
  0x93   : > { %v463_v37 = vpop.permute.xlu1 %462  ;;  %v542_v60 = vpop.permute.xlu2 %541 }
  0x94   : > { %v453_v39 = vpop.permute.xlu0 %452  ;;  %v548_v2 = vmul.f32 %v544_v44, %v542_v60  ;;  %v473_v3 = vmul.f32 %v470_v32, %v463_v37 }
  0x95   : > { %v471_v45 = vmul.f32 %v470_v32, %v453_v39  ;;  %v2337_v39 = vpop.eup %2336 }
  0x96   : > { %v477_v8 = vadd.f32 %v2332_v38, %v473_v3  ;;  %vm835_vm4 = vweird.f32 %v2337_v39 }
  0x97   : > { %v475_v47 = vadd.f32 %v2332_v38, %v471_v45 }
  0x99   : > { %v512_v53 = vadd.f32 %v508_v46, %v475_v47 }
  0x9b   : > { %v549_v54 = vadd.f32 %v545_v52, %v512_v53  ;;  %v468_v55 = vpop.permute.xlu1 %467 }
  0x9c   : > { %v458_v56 = vpop.permute.xlu0 %457  ;;  %v474_v59 = vmul.f32 %v470_v32, %v468_v55 }
  0x9d   : > { %vm553_vm0 = vcmp.ge.f32.partialorder %v549_v54, 0.0  ;;  %v557_v57 = vmul.f32 0.2, %v549_v54  ;;  %v472_v1 = vmul.f32 %v470_v32, %v458_v56 }
  0x9e   : > { %v478_v62 = vadd.f32 %v2332_v38, %v474_v59  ;;  %v2232_v59 = vld [vmem:[#allocation9 + $0xb8] sm:$0xff] }
  0x9f   : > { %v561_v58 = vsel %vm553_vm0, %v549_v54, %v557_v57  ;;  %v476_v7 = vadd.f32 %v2332_v38, %v472_v1  ;;  %v2216_v57 = vld [vmem:[#allocation9 + $0x38] sm:$0xff]  ;;  %1103 = vmatpush.bf16.msrb.mxu1 %v2232_v59  ;;  %v2231_v1 = vld [vmem:[#allocation9 + $0xb0] sm:$0xff]  ;;  %v2105_v59 = vld [vmem:[#allocation11 + $0xe0] sm:$0xf] }
  0xa0   : > { %567 = vst [vmem:[#allocation2 + $0x1] sm:$0xff] %v561_v58  ;;  %v2224_v58 = vld [vmem:[#allocation9 + $0x78] sm:$0xff]  ;;  %1077 = vmatpush.bf16.msra.mxu3 %v2216_v57 }
  0xa1   : > { %v513_v16 = vadd.f32 %v509_v10, %v476_v7  ;;  %1090 = vmatpush.bf16.msrb.mxu0 %v2224_v58  ;;  %v2468_v58 = vmov 8.0  }
  0xa3   : > { %v505_v61 = vpop.permute.xlu1 %504  ;;  %1104 = vmatpush.bf16.msrb.mxu1 %v2231_v1  ;;  %v2049_v1 = vld [vmem:[#allocation11 + $0x70] sm:$0xf] }
  0xa4   : > { %v511_v63 = vmul.f32 %v507_v36, %v505_v61  ;;  %v500_v0 = vpop.permute.xlu0 %499 }
  0xa5   : > { %v510_v6 = vmul.f32 %v507_v36, %v500_v0  ;;  %v2333_v36 = vld [vmem:[%s2655_s7] ss:$0 sm:$0xff]  ;;  %v2223_v0 = vld [vmem:[#allocation9 + $0x70] sm:$0xff] }
  0xa6   : > { %v515_v4 = vadd.f32 %v511_v63, %v478_v62  ;;  %v2215_v63 = vld [vmem:[#allocation9 + $0x30] sm:$0xff]  ;;  %1091 = vmatpush.bf16.msrb.mxu0 %v2223_v0 }
  0xa7   : > { %v514_v13 = vadd.f32 %v510_v6, %v477_v8  ;;  %1078 = vmatpush.bf16.msra.mxu3 %v2215_v63  ;;  %v2230_v6 = vld [vmem:[#allocation9 + $0xa8] sm:$0xff] }
  0xa8   : > { %v552_v5 = vadd.f32 %v548_v2, %v515_v4  ;;  %v2214_v4 = vld [vmem:[#allocation9 + $0x28] sm:$0xff]  ;;  %1105 = vmatpush.bf16.msrb.mxu1 %v2230_v6  ;;  %v2260_v6 = vld [vmem:[#allocation11 + $0xd4] sm:$0xf0] }
  0xaa   : > { %vm556_vm1 = vcmp.ge.f32.partialorder %v552_v5, 0.0  ;;  %v560_v9 = vmul.f32 0.2, %v552_v5 }
  0xab   : > { %v537_v11 = vpop.permute.xlu1 %536  ;;  %1079 = vmatpush.bf16.msra.mxu3 %v2214_v4  ;;  %v2334_v4 = vld [vmem:[%s2656_s8] ss:$0 sm:$0xff] }
  0xac   : > { %v564_v12 = vsel %vm556_vm1, %v552_v5, %v560_v9  ;;  %v547_v14 = vmul.f32 %v544_v44, %v537_v11  ;;  %v532_v15 = vpop.permute.xlu0 %531  ;;  %v2222_v5 = vld [vmem:[#allocation9 + $0x68] sm:$0xff]  ;;  %v2213_v11 = vld [vmem:[#allocation9 + $0x20] sm:$0xff] }
  0xad   : > { %570 = vst [vmem:[#allocation2 + $0x19] sm:$0xff] %v564_v12  ;;  %v546_v17 = vmul.f32 %v544_v44, %v532_v15  ;;  %v831_v44 = vmul.f32 16.0, %v2337_v39  ;;  %1092 = vmatpush.bf16.msrb.mxu0 %v2222_v5  ;;  %v2221_v12 = vld [vmem:[#allocation9 + $0x60] sm:$0xff] }
  0xae   : > { %v551_v18 = vadd.f32 %v547_v14, %v514_v13  ;;  %v2229_v13 = vld [vmem:[#allocation9 + $0xa0] sm:$0xff] }
  0xaf   : > { %v550_v19 = vadd.f32 %v546_v17, %v513_v16  ;;  %v832_v50 = vsub.f32 1.0, %v831_v44  ;;  %1080 = vmatpush.bf16.msra.mxu3 %v2213_v11  ;;  %1106 = vmatpush.bf16.msrb.mxu1 %v2229_v13  ;;  %v2212_v16 = vld [vmem:[#allocation9 + $0x18] sm:$0xff]  ;;  %v2246_v11 = vld [vmem:[#allocation11 + $0x64] sm:$0xf0] }
  0xb0   : > { %vm555_vm2 = vcmp.ge.f32.partialorder %v551_v18, 0.0  ;;  %v559_v20 = vmul.f32 0.2, %v551_v18  ;;  %v2220_v17 = vld [vmem:[#allocation9 + $0x58] sm:$0xff] }
  0xb1   : > { %vm554_vm3 = vcmp.ge.f32.partialorder %v550_v19, 0.0  ;;  %v558_v21 = vmul.f32 0.2, %v550_v19  ;;  %v833_v53 = vmul.f32 %v2337_v39, %v832_v50  ;;  %1093 = vmatpush.bf16.msrb.mxu0 %v2221_v12  ;;  %v2089_v12 = vld [vmem:[#allocation11 + $0xc0] sm:$0xf] }
  0xb2   : > { %v563_v22 = vsel %vm555_vm2, %v551_v18, %v559_v20  ;;  %v2228_v18 = vld [vmem:[#allocation9 + $0x98] sm:$0xff] }
  0xb3   : > { %569 = vst [vmem:[#allocation2 + $0x11] sm:$0xff] %v563_v22  ;;  %v562_v23 = vsel %vm554_vm3, %v550_v19, %v558_v21  ;;  %v834_v56 = vadd.f32 %v2337_v39, %v833_v53  ;;  %1081 = vmatpush.bf16.msra.mxu3 %v2212_v16  ;;  %1107 = vmatpush.bf16.msrb.mxu1 %v2228_v18  ;;  %v2211_v21 = vld [vmem:[#allocation9 + $0x10] sm:$0xff] }
  0xb4   : > { %568 = vst [vmem:[#allocation2 + $0x9] sm:$0xff] %v562_v23  ;;  %v2219_v22 = vld [vmem:[#allocation9 + $0x50] sm:$0xff] }
  0xb5   : > { %v836_v62 = vsel %vm835_vm4, %v2337_v39, %v834_v56  ;;  %1094 = vmatpush.bf16.msrb.mxu0 %v2220_v17  ;;  %v2227_v23 = vld [vmem:[#allocation9 + $0x90] sm:$0xff]  ;;  %v2264_v56 = vld [vmem:[#allocation11 + $0xf4] sm:$0xf0] }
  0xb7   : > { %1082 = vmatpush.bf16.msra.mxu3 %v2211_v21  ;;  %1108 = vmatpush.bf16.msrb.mxu1 %v2227_v23  ;;  %v2033_v21 = vld [vmem:[#allocation11 + $0x50] sm:$0xf] }
  0xb8   : > { %v2081_v23 = vld [vmem:[#allocation11 + $0xb0] sm:$0xf] }
  0xb9   : > { %1095 = vmatpush.bf16.msrb.mxu0 %v2219_v22  ;;  %v2244_v22 = vld [vmem:[#allocation11 + $0x54] sm:$0xf0] }
  0xba   : > { %v577_v24 = vld [vmem:[#allocation2 + $0x11] ss:$2 sm:$0xff]  ;;  %v581_v25 = vld [vmem:[#allocation2 + $0x12] ss:$2 sm:$0xff] }
  0xbb   : > { %v571_v26 = vld [vmem:[#allocation2] ss:$2 sm:$0xff]  ;;  %v573_v27 = vld [vmem:[#allocation2 + $0x10] ss:$2 sm:$0xff]  ;;  %v575_v28 = vld [vmem:[#allocation2 + $0x1] ss:$2 sm:$0xff] }
  0xbc   : > { %v582_v29 = vpack.c.bf16 %v573_v27, %v571_v26  ;;  %v583_v30 = vpack.c.bf16 %v577_v24, %v575_v28  ;;  %v579_v31 = vld [vmem:[#allocation2 + $0x2] ss:$2 sm:$0xff]  ;;  %v2210_v26 = vld [vmem:[#allocation9 + $0x8] sm:$0xff] }
  0xbd   : > { %v584_v32 = vpack.c.bf16 %v581_v25, %v579_v31  ;;  %v2218_v27 = vld [vmem:[#allocation9 + $0x48] sm:$0xff]  ;;  %1083 = vmatpush.bf16.msra.mxu3 %v2210_v26  ;;  %v2217_v31 = vld [vmem:[#allocation9 + $0x40] sm:$0xff]  ;;  %v2256_v26 = vld [vmem:[#allocation11 + $0xb4] sm:$0xf0] }
  0xbe   : > { %789 = vmatmul.bf16.vlgmr.msra.gmra.mxu0 %v582_v29  ;;  %803 = vmatmul.bf16.vlgmr.msra.gmra.mxu1 %v583_v30  ;;  %v2226_v28 = vld [vmem:[#allocation9 + $0x88] sm:$0xff]  ;;  %v2209_v30 = vld [vmem:[#allocation9] sm:$0xff] }
  0xbf   : > { %817 = vmatmul.bf16.vlgmr.msra.gmra.mxu2 %v584_v32  ;;  %1096 = vmatpush.bf16.msrb.mxu0 %v2218_v27  ;;  %v2082_v27 = vor.u32 %v2256_v26, %v2081_v23  ;;  %v2027_v23 = vld [vmem:[#allocation11 + $0x48] sm:$0xf0] }
  0xc0   : > { %1109 = vmatpush.bf16.msrb.mxu1 %v2226_v28  ;;  %v2171_v26 = vld [vmem:[#allocation11 + $0x168] sm:$0xf0] }
  0xc1   : > { %1084 = vmatpush.bf16.msra.mxu3 %v2209_v30 }
  0xc3   : > { %1097 = vmatpush.bf16.msrb.mxu0 %v2217_v31  ;;  %v2025_v31 = vld [vmem:[#allocation11 + $0x40] sm:$0xf] }
 0x13b   : > { %v790_v33 = vpop.f32.mrf.mxu0  ;;  %v804_v34 = vpop.f32.mrf.mxu1 }
 0x13c   : > { %v791_v40 = vadd.f32 %v2333_v36, %v790_v33  ;;  %v2225_v33 = vld [vmem:[#allocation9 + $0x80] sm:$0xff] }
 0x13d   : > { %1110 = vmatpush.bf16.msrb.mxu1 %v2225_v33  ;;  %v2073_v33 = vld [vmem:[#allocation11 + $0xa0] sm:$0xf] }
 0x13e   : > { %v805_v45 = vadd.f32 %v804_v34, %v791_v40 }
 0x142   : > { %v818_v37 = vpop.f32.mrf.mxu2 }
 0x143   : > { %v792_v38 = vpop.f32.mrf.mxu0  ;;  %v806_v42 = vpop.f32.mrf.mxu1  ;;  %v819_v48 = vadd.f32 %v818_v37, %v805_v45 }
 0x144   : > { %v793_v41 = vadd.f32 %v2333_v36, %v792_v38 }
 0x146   : > { %v807_v46 = vadd.f32 %v806_v42, %v793_v41 }
 0x14a   : > { %v820_v47 = vpop.f32.mrf.mxu2 }
 0x14b   : > { %v821_v49 = vadd.f32 %v820_v47, %v807_v46 }
 0x14d   : > { %v823_v51 = vadd.f32 %v821_v49, %v819_v48 }
 0x14f   : > { %v824_v52 = vrot.slane %v823_v51, 4 }
 0x151   : > { %v825_v54 = vadd.f32 %v824_v52, %v823_v51 }
 0x153   : > { %v826_v55 = vrot.slane %v825_v54, 2 }
 0x155   : > { %v827_v60 = vadd.f32 %v826_v55, %v825_v54  ;;  %v2113_v55 = vld [vmem:[#allocation11 + $0xf0] sm:$0xf] }
 0x156   : > { %v2114_v57 = vor.u32 %v2264_v56, %v2113_v55  ;;  %v2043_v56 = vld [vmem:[#allocation11 + $0x68] sm:$0xf0] }
 0x157   : > { %v828_v61 = vrot.slane %v827_v60, 1 }
 0x158   : > { %1470 = vmatpush.bf16.msrb.mxu3 %v2114_v57  ;;  %v2252_v57 = vld [vmem:[#allocation11 + $0x94] sm:$0xf0] }
 0x159   : > { %v829_v2 = vadd.f32 %v828_v61, %v827_v60  ;;  %v2262_v60 = vld [vmem:[#allocation11 + $0xe4] sm:$0xf0] }
 0x15a   : > { %v2106_v61 = vor.u32 %v2262_v60, %v2105_v59 }
 0x15b   : > { %v837_v3 = vmul.f32 %v836_v62, %v829_v2  ;;  %v2248_v2 = vld [vmem:[#allocation11 + $0x74] sm:$0xf0] }
 0x15c   : > { %1471 = vmatpush.bf16.msrb.mxu3 %v2106_v61  ;;  %v2050_v5 = vor.u32 %v2248_v2, %v2049_v1  ;;  %v2057_v1 = vld [vmem:[#allocation11 + $0x80] sm:$0xf] }
 0x15d   : > { %v838_v7 = vsub.f32 %v819_v48, %v837_v3  ;;  %v839_v8 = vsub.f32 %v821_v49, %v837_v3  ;;  %v2097_v3 = vld [vmem:[#allocation11 + $0xd0] sm:$0xf] }
 0x15e   : > { %1457 = vmatpush.bf16.msrb.mxu2 %v2050_v5  ;;  %v2276_v5 = vld [vmem:[#allocation11 + $0x154] sm:$0xf0] }
 0x15f   : > { %v840_v9 = vmul.f32 %v838_v7, %v838_v7  ;;  %v841_v10 = vmul.f32 %v839_v8, %v839_v8 }
 0x161   : > { %v842_v14 = vadd.f32 %v841_v10, %v840_v9  ;;  %v2041_v10 = vld [vmem:[#allocation11 + $0x60] sm:$0xf] }
 0x163   : > { %v843_v15 = vrot.slane %v842_v14, 4 }
 0x165   : > { %v844_v19 = vadd.f32 %v843_v15, %v842_v14  ;;  %v2042_v14 = vor.u32 %v2246_v11, %v2041_v10  ;;  %v2258_v15 = vld [vmem:[#allocation11 + $0xc4] sm:$0xf0]  ;;  %v2279_v10 = vld [vmem:[#allocation11 + $0x174] sm:$0xf] }
 0x166   : > { %v2090_v17 = vor.u32 %v2258_v15, %v2089_v12  ;;  %v2236_v15 = vld [vmem:[#allocation11 + $0x14] sm:$0xf0] }
 0x167   : > { %v845_v20 = vrot.slane %v844_v19, 2  ;;  %1458 = vmatpush.bf16.msrb.mxu2 %v2042_v14  ;;  %v2001_v14 = vld [vmem:[#allocation11 + $0x10] sm:$0xf] }
 0x169   : > { %v846_v24 = vadd.f32 %v845_v20, %v844_v19 }
 0x16b   : > { %v847_v25 = vrot.slane %v846_v24, 1 }
 0x16d   : > { %v848_v29 = vadd.f32 %v847_v25, %v846_v24  ;;  %v2034_v25 = vor.u32 %v2244_v22, %v2033_v21  ;;  %v2241_v21 = vld [vmem:[#allocation11 + $0x44] sm:$0xf] }
 0x16f   : > { %v849_v32 = vmul.f32 %v848_v29, %v836_v62  ;;  %1459 = vmatpush.bf16.msrb.mxu2 %v2034_v25  ;;  %v2277_v25 = vld [vmem:[#allocation11 + $0x164] sm:$0xf] }
 0x171   : > { %v850_v34 = vadd.f32 1e-05, %v849_v32  ;;  %v2242_v32 = vld [vmem:[#allocation11 + $0x44] sm:$0xf0] }
 0x173   : > { %2338 = vrsqrt.f32 %v850_v34  ;;  %vm857_vm6 = vweird.f32 %v850_v34 }
 0x174   : > { %2340 = vrcp.f32 %v2468_v58 }
 0x179   : > { %v2339_v35 = vpop.eup %2338 }
 0x17a   : > { %v852_v36 = vmul.f32 %v2339_v35, %v850_v34  ;;  %vm858_vm5 = vweird.f32 %v2339_v35  ;;  %v2601_v0 = vpop.eup %2340 }
 0x17b   : > { %vm859_vm7 = vmor %vm857_vm6, %vm858_vm5  ;;  %vm1127_vm10 = vweird.f32 %v2601_v0 }
 0x17c   : > { %v853_v37 = vmul.f32 %v2339_v35, %v852_v36  ;;  %v2177_v36 = vld [vmem:[#allocation11 + $0x170] sm:$0xf] }
 0x17e   : > { %v854_v38 = vmul.f32 0.5, %v853_v37  ;;  %v2280_v37 = vld [vmem:[#allocation11 + $0x174] sm:$0xf0] }
 0x180   : > { %v855_v39 = vsub.f32 1.5, %v854_v38  ;;  %v2247_v38 = vld [vmem:[#allocation11 + $0x74] sm:$0xf] }
 0x182   : > { %v856_v40 = vmul.f32 %v2339_v35, %v855_v39  ;;  %v2178_v39 = vor.u32 %v2280_v37, %v2177_v36  ;;  %v2239_v36 = vld [vmem:[#allocation11 + $0x34] sm:$0xf]  ;;  %v2019_v37 = vld [vmem:[#allocation11 + $0x38] sm:$0xf0] }
 0x184   : > { %v860_v41 = vsel %vm859_vm7, %v2339_v35, %v856_v40  ;;  %v2026_v35 = vor.u32 %v2242_v32, %v2025_v31  ;;  %v2051_v40 = vld [vmem:[#allocation11 + $0x78] sm:$0xf0]  ;;  %1483 = vmatpush.bf16.msra.mxu0 %v2178_v39 }
 0x185   : > { %v861_v42 = vmul.f32 %v860_v41, %v838_v7  ;;  %v862_v44 = vmul.f32 %v860_v41, %v839_v8  ;;  %v2098_v7 = vor.u32 %v2260_v6, %v2097_v3  ;;  %v1123_v8 = vmul.f32 8.0, %v2601_v0  ;;  %v2254_v41 = vld [vmem:[#allocation11 + $0xa4] sm:$0xf0]  ;;  %v2243_v6 = vld [vmem:[#allocation11 + $0x54] sm:$0xf] }
 0x186   : > { %1460 = vmatpush.bf16.msrb.mxu2 %v2026_v35 }
 0x187   : > { %vm863_vm8 = vcmp.ge.f32.partialorder %v861_v42, 0.0  ;;  %vm864_vm9 = vcmp.ge.f32.partialorder %v862_v44, 0.0  ;;  %v865_v45 = vmul.f32 0.2, %v861_v42  ;;  %v866_v46 = vmul.f32 0.2, %v862_v44  ;;  %1472 = vmatpush.bf16.msrb.mxu3 %v2098_v7 }
 0x188   : > { %v1124_v19 = vsub.f32 1.0, %v1123_v8  ;;  %v2035_v8 = vld [vmem:[#allocation11 + $0x58] sm:$0xf0] }
 0x189   : > { %v867_v47 = vsel %vm863_vm8, %v861_v42, %v865_v45  ;;  %v868_v48 = vsel %vm864_vm9, %v862_v44, %v866_v46  ;;  %v2054_v44 = vor.u32 %v2247_v38, %v2051_v40  ;;  %v2074_v45 = vor.u32 %v2254_v41, %v2073_v33  ;;  %v2145_v33 = vld [vmem:[#allocation11 + $0x130] sm:$0xf]  ;;  %v2263_v38 = vld [vmem:[#allocation11 + $0xf4] sm:$0xf]  ;;  %v2115_v41 = vld [vmem:[#allocation11 + $0xf8] sm:$0xf0] }
 0x18a   : > { %871 = vst [vmem:[#allocation3 + $0x1] sm:$0xff] %v867_v47  ;;  %v1125_v29 = vmul.f32 %v2601_v0, %v1124_v19  ;;  %v2017_v47 = vld [vmem:[#allocation11 + $0x30] sm:$0xf]  ;;  %v2153_v19 = vld [vmem:[#allocation11 + $0x140] sm:$0xf]  ;;  %v2022_v40 = vor.u32 %v2239_v36, %v2019_v37  ;;  %vm1630_vm8 = vcmask 1046528  }
 0x18b   : > { %872 = vst [vmem:[#allocation3 + $0x9] sm:$0xff] %v868_v48  ;;  %1473 = vmatpush.bf16.msrb.mxu3 %v2090_v17  ;;  %v2240_v48 = vld [vmem:[#allocation11 + $0x34] sm:$0xf0]  ;;  %1496 = vmatpush.bf16.msra.mxu1 %v2054_v44  ;;  %v2163_v44 = vld [vmem:[#allocation11 + $0x158] sm:$0xf0]  ;;  %vm1643_vm9 = vcmask 1045504  }
 0x18c   : > { %v1126_v46 = vadd.f32 %v2601_v0, %v1125_v29  ;;  %v2174_v29 = vor.u32 %v2277_v25, %v2171_v26  ;;  %v2123_v36 = vld [vmem:[#allocation11 + $0x108] sm:$0xf0] }
 0x18e   : > { %v2615_v61 = vsel %vm1127_vm10, %v2601_v0, %v1126_v46  ;;  %v2038_v0 = vor.u32 %v2243_v6, %v2035_v8  ;;  %v2121_v8 = vld [vmem:[#allocation11 + $0x100] sm:$0xf]  ;;  %vm1689_vm10 = vcmask 7168  }
 0x18f   : > { %1474 = vmatpush.bf16.msrb.mxu3 %v2082_v27 }
 0x192   : > { %v873_v49 = vld [vmem:[#allocation3] ss:$2 sm:$0xff]  ;;  %v875_v50 = vld [vmem:[#allocation3 + $0x1] ss:$2 sm:$0xff] }
 0x193   : > { %v877_v51 = vld [vmem:[#allocation3 + $0x2] ss:$2 sm:$0xff]  ;;  %v878_v52 = vpack.c.bf16 %v873_v49, %v873_v49  ;;  %v879_v53 = vpack.c.bf16 %v875_v50, %v875_v50  ;;  %v2065_v49 = vld [vmem:[#allocation11 + $0x90] sm:$0xf]  ;;  %1475 = vmatpush.bf16.msrb.mxu3 %v2074_v45  ;;  %v2118_v45 = vor.u32 %v2263_v38, %v2115_v41 }
 0x194   : > { %v880_v54 = vpack.c.bf16 %v877_v51, %v877_v51  ;;  %v2018_v51 = vor.u32 %v2240_v48, %v2017_v47  ;;  %v2066_v60 = vor.u32 %v2252_v57, %v2065_v49  ;;  %v2137_v48 = vld [vmem:[#allocation11 + $0x120] sm:$0xf]  ;;  %v2270_v49 = vld [vmem:[#allocation11 + $0x124] sm:$0xf0]  ;;  %v2273_v57 = vld [vmem:[#allocation11 + $0x144] sm:$0xf] }
 0x195   : > { %1085 = vmatmul.bf16.vlgmr.msra.gmra.mxu3 %v878_v52  ;;  %1098 = vmatmul.bf16.vlgmr.msrb.gmra.mxu0 %v879_v53  ;;  %v2169_v52 = vld [vmem:[#allocation11 + $0x160] sm:$0xf]  ;;  %v2278_v53 = vld [vmem:[#allocation11 + $0x164] sm:$0xf0] }
 0x196   : > { %1111 = vmatmul.bf16.vlgmr.msrb.gmra.mxu1 %v880_v54  ;;  %v2245_v54 = vld [vmem:[#allocation11 + $0x64] sm:$0xf]  ;;  %v2170_v55 = vor.u32 %v2278_v53, %v2169_v52  ;;  %1461 = vmatpush.bf16.msrb.mxu2 %v2018_v51  ;;  %v2011_v52 = vld [vmem:[#allocation11 + $0x28] sm:$0xf0] }
 0x197   : > { %v2046_v59 = vor.u32 %v2245_v54, %v2043_v56  ;;  %1476 = vmatpush.bf16.msrb.mxu3 %v2066_v60  ;;  %v2237_v51 = vld [vmem:[#allocation11 + $0x24] sm:$0xf]  ;;  %v2107_v56 = vld [vmem:[#allocation11 + $0xe8] sm:$0xf0]  ;;  %v2129_v60 = vld [vmem:[#allocation11 + $0x110] sm:$0xf] }
 0x198   : > { %1484 = vmatpush.bf16.msra.mxu0 %v2170_v55  ;;  %v2261_v53 = vld [vmem:[#allocation11 + $0xe4] sm:$0xf]  ;;  %v2014_v55 = vor.u32 %v2237_v51, %v2011_v52 }
 0x199   : > { %1497 = vmatpush.bf16.msra.mxu1 %v2046_v59  ;;  %v2110_v59 = vor.u32 %v2261_v53, %v2107_v56 }
 0x19d   : > { %1498 = vmatpush.bf16.msra.mxu1 %v2038_v0  ;;  %v2233_v0 = vld [vmem:[#allocation11 + $0x4] sm:$0xf] }
 0x212   : > { %v1099_v62 = vpop.f32.mrf.mxu0 }
 0x213   : > { %v1112_v63 = vpop.f32.mrf.mxu1 }
 0x218   : > { %v1086_v9 = vpop.f32.mrf.mxu3 }
 0x219   : > { %v1087_v13 = vadd.f32 %v2334_v4, %v1086_v9  ;;  %v2161_v4 = vld [vmem:[#allocation11 + $0x150] sm:$0xf]  ;;  %v2250_v9 = vld [vmem:[#allocation11 + $0x84] sm:$0xf0] }
 0x21a   : > { %v1101_v16 = vpop.f32.mrf.mxu0  ;;  %v2162_v7 = vor.u32 %v2276_v5, %v2161_v4  ;;  %v2058_v12 = vor.u32 %v2250_v9, %v2057_v1  ;;  %v2003_v4 = vld [vmem:[#allocation11 + $0x18] sm:$0xf0]  ;;  %v2259_v5 = vld [vmem:[#allocation11 + $0xd4] sm:$0xf]  ;;  %v2266_v9 = vld [vmem:[#allocation11 + $0x104] sm:$0xf0] }
 0x21b   : > { %v1100_v18 = vadd.f32 %v1099_v62, %v1087_v13  ;;  %v1114_v20 = vpop.f32.mrf.mxu1  ;;  %v2009_v62 = vld [vmem:[#allocation11 + $0x20] sm:$0xf]  ;;  %v2179_v13 = vld [vmem:[#allocation11 + $0x178] sm:$0xf0] }
 0x21c   : > { %1485 = vmatpush.bf16.msra.mxu0 %v2162_v7  ;;  %v2182_v16 = vor.u32 %v2279_v10, %v2179_v13  ;;  %v2274_v20 = vld [vmem:[#allocation11 + $0x144] sm:$0xf0]  ;;  %1477 = vmatpush.bf16.msrb.mxu3 %v2058_v12  ;;  %v2099_v7 = vld [vmem:[#allocation11 + $0xd8] sm:$0xf0]  ;;  %v1995_v12 = vld [vmem:[#allocation11 + $0x8] sm:$0xf0] }
 0x21d   : > { %v2607_v24 = vadd.f32 %v1112_v63, %v1100_v18  ;;  %v2238_v63 = vld [vmem:[#allocation11 + $0x24] sm:$0xf0]  ;;  %v2002_v18 = vor.u32 %v2236_v15, %v2001_v14  ;;  %v2154_v22 = vor.u32 %v2274_v20, %v2153_v19  ;;  %v2257_v13 = vld [vmem:[#allocation11 + $0xc4] sm:$0xf]  ;;  %v2122_v14 = vor.u32 %v2266_v9, %v2121_v8  ;;  %v2091_v15 = vld [vmem:[#allocation11 + $0xc8] sm:$0xf0] }
 0x21e   : > { %v2010_v3 = vor.u32 %v2238_v63, %v2009_v62  ;;  %v2268_v62 = vld [vmem:[#allocation11 + $0x114] sm:$0xf0]  ;;  %v2235_v63 = vld [vmem:[#allocation11 + $0x14] sm:$0xf]  ;;  %v1998_v20 = vor.u32 %v2233_v0, %v1995_v12  ;;  %v2094_v25 = vor.u32 %v2257_v13, %v2091_v15 }
 0x21f   : > { %v1116_v28 = vrot.slane %v2607_v24, 4  ;;  %v2006_v6 = vor.u32 %v2235_v63, %v2003_v4 }
 0x220   : > { %v1088_v30 = vpop.f32.mrf.mxu3  ;;  %1462 = vmatpush.bf16.msrb.mxu2 %v2010_v3  ;;  %1522 = vmatpush.bf16.msra.mxu3 %v2182_v16  ;;  %v2130_v3 = vor.u32 %v2268_v62, %v2129_v60  ;;  %v2271_v16 = vld [vmem:[#allocation11 + $0x134] sm:$0xf] }
 0x221   : > { %v1117_v34 = vadd.f32 %v1116_v28, %v2607_v24  ;;  %v2030_v28 = vor.u32 %v2241_v21, %v2027_v23  ;;  %1486 = vmatpush.bf16.msra.mxu0 %v2154_v22  ;;  %v2234_v30 = vld [vmem:[#allocation11 + $0x4] sm:$0xf0]  ;;  %v2269_v22 = vld [vmem:[#allocation11 + $0x124] sm:$0xf]  ;;  %v2139_v23 = vld [vmem:[#allocation11 + $0x128] sm:$0xf0] }
 0x223   : > { %v1118_v42 = vrot.slane %v1117_v34, 2  ;;  %1499 = vmatpush.bf16.msra.mxu1 %v2030_v28  ;;  %v2255_v28 = vld [vmem:[#allocation11 + $0xb4] sm:$0xf] }
 0x224   : > { %1463 = vmatpush.bf16.msrb.mxu2 %v2002_v18  ;;  %1523 = vmatpush.bf16.msra.mxu3 %v2174_v29  ;;  %v2147_v18 = vld [vmem:[#allocation11 + $0x138] sm:$0xf0] }
 0x225   : > { %v1119_v50 = vadd.f32 %v1118_v42, %v1117_v34  ;;  %v2272_v34 = vld [vmem:[#allocation11 + $0x134] sm:$0xf0]  ;;  %v2275_v42 = vld [vmem:[#allocation11 + $0x154] sm:$0xf]  ;;  %v2150_v21 = vor.u32 %v2271_v16, %v2147_v18  ;;  %v2083_v29 = vld [vmem:[#allocation11 + $0xb8] sm:$0xf0] }
 0x226   : > { %v2146_v35 = vor.u32 %v2272_v34, %v2145_v33  ;;  %v2166_v46 = vor.u32 %v2275_v42, %v2163_v44  ;;  %v2075_v33 = vld [vmem:[#allocation11 + $0xa8] sm:$0xf0] }
 0x227   : > { %v1120_v58 = vrot.slane %v1119_v50, 1  ;;  %1500 = vmatpush.bf16.msra.mxu1 %v2022_v40  ;;  %v2067_v40 = vld [vmem:[#allocation11 + $0x98] sm:$0xf0] }
 0x228   : > { %1487 = vmatpush.bf16.msra.mxu0 %v2146_v35  ;;  %1524 = vmatpush.bf16.msra.mxu3 %v2166_v46  ;;  %v2265_v35 = vld [vmem:[#allocation11 + $0x104] sm:$0xf] }
 0x229   : > { %v1121_v2 = vadd.f32 %v1120_v58, %v1119_v50  ;;  %v2138_v50 = vor.u32 %v2270_v49, %v2137_v48  ;;  %v2155_v58 = vld [vmem:[#allocation11 + $0x148] sm:$0xf0]  ;;  %v2126_v41 = vor.u32 %v2265_v35, %v2123_v36  ;;  %v2249_v46 = vld [vmem:[#allocation11 + $0x84] sm:$0xf] }
 0x22a   : > { %v2158_v1 = vor.u32 %v2273_v57, %v2155_v58 }
 0x22b   : > { %v1129_v11 = vmul.f32 %v2615_v61, %v1121_v2  ;;  %1501 = vmatpush.bf16.msra.mxu1 %v2014_v55 }
 0x22c   : > { %1488 = vmatpush.bf16.msra.mxu0 %v2138_v50  ;;  %1525 = vmatpush.bf16.msra.mxu3 %v2158_v1 }
 0x22d   : > { %v2619_v17 = vsub.f32 %v2607_v24, %v1129_v11  ;;  %v1993_v24 = vld [vmem:[#allocation11] sm:$0xf]  ;;  %v2102_v11 = vor.u32 %v2259_v5, %v2099_v7 }
 0x22e   : > { %v1994_v32 = vor.u32 %v2234_v30, %v1993_v24  ;;  %v2267_v24 = vld [vmem:[#allocation11 + $0x114] sm:$0xf]  ;;  %v2086_v30 = vor.u32 %v2255_v28, %v2083_v29 }
 0x22f   : > { %v1131_v27 = vmul.f32 %v2619_v17, %v2619_v17  ;;  %1502 = vmatpush.bf16.msra.mxu1 %v2006_v6 }
 0x230   : > { %1464 = vmatpush.bf16.msrb.mxu2 %v1994_v32  ;;  %1489 = vmatpush.bf16.msra.mxu0 %v2130_v3  ;;  %v2253_v32 = vld [vmem:[#allocation11 + $0xa4] sm:$0xf] }
 0x231   : > { %v1132_v31 = vrot.slane %v1131_v27, 4  ;;  %1526 = vmatpush.bf16.msra.mxu3 %v2150_v21  ;;  %v2078_v37 = vor.u32 %v2253_v32, %v2075_v33 }
 0x233   : > { %v1133_v39 = vadd.f32 %v1132_v31, %v1131_v27  ;;  %v2142_v27 = vor.u32 %v2269_v22, %v2139_v23  ;;  %1503 = vmatpush.bf16.msra.mxu1 %v1998_v20  ;;  %v2131_v31 = vld [vmem:[#allocation11 + $0x118] sm:$0xf0] }
 0x234   : > { %1509 = vmatpush.bf16.msra.mxu2 %v2118_v45  ;;  %1490 = vmatpush.bf16.msra.mxu0 %v2122_v14  ;;  %v2134_v34 = vor.u32 %v2267_v24, %v2131_v31 }
 0x235   : > { %v1134_v47 = vrot.slane %v1133_v39, 2  ;;  %1527 = vmatpush.bf16.msra.mxu3 %v2142_v27 }
 0x237   : > { %v1135_v54 = vadd.f32 %v1134_v47, %v1133_v39  ;;  %v2251_v39 = vld [vmem:[#allocation11 + $0x94] sm:$0xf]  ;;  %v2059_v47 = vld [vmem:[#allocation11 + $0x88] sm:$0xf0] }
 0x238   : > { %1510 = vmatpush.bf16.msra.mxu2 %v2110_v59  ;;  %v2070_v45 = vor.u32 %v2251_v39, %v2067_v40  ;;  %v2062_v50 = vor.u32 %v2249_v46, %v2059_v47 }
 0x239   : > { %v1136_v2 = vrot.slane %v1135_v54, 1  ;;  %1528 = vmatpush.bf16.msra.mxu3 %v2134_v34 }
 0x23b   : > { %v1137_v10 = vadd.f32 %v1136_v2, %v1135_v54 }
 0x23c   : > { %1511 = vmatpush.bf16.msra.mxu2 %v2102_v11 }
 0x23d   : > { %v1138_v19 = vmul.f32 %v1137_v10, %v2615_v61  ;;  %1529 = vmatpush.bf16.msra.mxu3 %v2126_v41 }
 0x23f   : > { %v1139_v26 = vadd.f32 1e-05, %v1138_v19 }
 0x240   : > { %1512 = vmatpush.bf16.msra.mxu2 %v2094_v25 }
 0x241   : > { %2342 = vrsqrt.f32 %v1139_v26  ;;  %vm1146_vm12 = vweird.f32 %v1139_v26 }
 0x244   : > { %1513 = vmatpush.bf16.msra.mxu2 %v2086_v30 }
 0x247   : > { %v2343_v38 = vpop.eup %2342 }
 0x248   : > { %v1141_v42 = vmul.f32 %v2343_v38, %v1139_v26  ;;  %1514 = vmatpush.bf16.msra.mxu2 %v2078_v37  ;;  %vm1147_vm11 = vweird.f32 %v2343_v38 }
 0x249   : > { %vm1148_vm13 = vmor %vm1146_vm12, %vm1147_vm11 }
 0x24a   : > { %v1142_v44 = vmul.f32 %v2343_v38, %v1141_v42 }
 0x24c   : > { %v1143_v48 = vmul.f32 0.5, %v1142_v44  ;;  %1515 = vmatpush.bf16.msra.mxu2 %v2070_v45 }
 0x24e   : > { %v1144_v49 = vsub.f32 1.5, %v1143_v48 }
 0x250   : > { %v1145_v51 = vmul.f32 %v2343_v38, %v1144_v49  ;;  %1516 = vmatpush.bf16.msra.mxu2 %v2062_v50 }
 0x252   : > { %v1149_v52 = vsel %vm1148_vm13, %v2343_v38, %v1145_v51  ;;  %v1597_v38 = vlaneseq }
 0x253   : > { %v1150_v53 = vmul.f32 %v1149_v52, %v2619_v17  ;;  %v1211_v17 = vld [vmem:[%s2657_s9] sm:$0x3] }
 0x254   : > { %v1213_v2 = vperm.slane %v1211_v17, 0  ;;  %v1214_v13 = vperm.slane %v1211_v17, 1  ;;  %vm1599_vm15 = vcmp.lt.s32.totalorder %v1597_v38, 256 }
 0x255   : > { %vm1151_vm14 = vcmp.ge.f32.partialorder %v1150_v53, 0.0  ;;  %v1152_v54 = vmul.f32 0.2, %v1150_v53  ;;  %1601 = vst.msk [vmem:[#allocation5] ss:$8 sm:$0x3] %vm1599_vm15, %v2466_v43 }
 0x256   : > { %1604 = vst.msk [vmem:[#allocation5 + $0x11] ss:$8 sm:$0x3] %vm1599_vm15, %v2466_v43 }
 0x257   : > { %v1153_v55 = vsel %vm1151_vm14, %v1150_v53, %v1152_v54 }
 0x258   : > { %1156 = vst [vmem:[#allocation4 + $0x1] sm:$0xff] %v1153_v55  ;;  %v1161_v56 = vpack.c.bf16 %v1153_v55, %v1153_v55 }
 0x25a   : > { %1478 = vmatmul.bf16.vlgmr.msrb.gmra.mxu3 %v1161_v56 }
 0x25f   : > { %v1157_v57 = vld [vmem:[#allocation4] sm:$0xff] }
 0x260   : > { %v1159_v58 = vld [vmem:[#allocation4 + $0x2] sm:$0xff]  ;;  %v1160_v59 = vpack.c.bf16 %v1157_v57, %v1157_v57 }
 0x261   : > { %v1162_v60 = vpack.c.bf16 %v1159_v58, %v1159_v58 }
 0x262   : > { %1465 = vmatmul.bf16.vlgmr.msrb.gmra.mxu2 %v1160_v59  ;;  %1504 = vmatmul.bf16.vlgmr.msra.gmra.mxu1 %v1160_v59 }
 0x263   : > { %1491 = vmatmul.bf16.vlgmr.msra.gmra.mxu0 %v1162_v60 }
 0x26a   : > { %1530 = vmatmul.bf16.vlgmr.msra.gmra.mxu3 %v1162_v60 }
 0x272   : > { %1517 = vmatmul.bf16.vlgmr.msra.gmra.mxu2 %v1161_v56 }
 0x2dd   : > { %v1479_v62 = vpop.f32.mrf.mxu3 }
 0x2df   : > { %v1505_v1 = vpop.f32.mrf.mxu1 }
 0x2e0   : > { %v1492_v63 = vpop.f32.mrf.mxu0  ;;  %v1506_v16 = vadd.f32 %v1505_v1, %v1214_v13  ;;  %v1652_v13 = vld [vmem:[%s2653_s5] sm:$0x3f] }
 0x2e1   : > { %v1658_v38 = vperm.slane %v1652_v13, 4 }
 0x2e5   : > { %v1466_v3 = vpop.f32.mrf.mxu2  ;;  %v1481_v4 = vpop.f32.mrf.mxu3 }
 0x2e6   : > { %v1467_v5 = vadd.f32 %v1466_v3, %v1213_v2 }
 0x2e7   : > { %v1507_v8 = vpop.f32.mrf.mxu1 }
 0x2e8   : > { %v1494_v6 = vpop.f32.mrf.mxu0  ;;  %v1480_v7 = vadd.f32 %v1479_v62, %v1467_v5 }
 0x2ea   : > { %v1493_v9 = vadd.f32 %v1492_v63, %v1480_v7 }
 0x2ec   : > { %v1535_v10 = vrot.slane %v1493_v9, 4 }
 0x2ed   : > { %v1468_v11 = vpop.f32.mrf.mxu2  ;;  %v1531_v0 = vpop.f32.mrf.mxu3 }
 0x2ee   : > { %v1536_v12 = vadd.f32 %v1535_v10, %v1493_v9 }
 0x2f0   : > { %v1537_v14 = vrot.slane %v1536_v12, 2 }
 0x2f2   : > { %v1538_v15 = vadd.f32 %v1537_v14, %v1536_v12 }
 0x2f4   : > { %v1539_v18 = vrot.slane %v1538_v15, 1 }
 0x2f5   : > { %v1518_v19 = vpop.f32.mrf.mxu2  ;;  %v1533_v20 = vpop.f32.mrf.mxu3 }
 0x2f6   : > { %v1540_v21 = vadd.f32 %v1539_v18, %v1538_v15  ;;  %v1519_v22 = vadd.f32 %v1518_v19, %v1506_v16  ;;  %v1654_v19 = vperm.slane %v1652_v13, 0  ;;  %v1655_v20 = vperm.slane %v1652_v13, 1 }
 0x2f8   : > { %v1547_v23 = vmul.f32 %v1540_v21, %v2615_v61  ;;  %v1532_v25 = vadd.f32 %v1531_v0, %v1519_v22 }
 0x2fa   : > { %v1549_v26 = vsub.f32 %v1493_v9, %v1547_v23  ;;  %v1541_v27 = vrot.slane %v1532_v25, 4  ;;  %v1656_v23 = vperm.slane %v1652_v13, 2 }
 0x2fc   : > { %v1551_v28 = vmul.f32 %v1549_v26, %v1549_v26  ;;  %v1542_v29 = vadd.f32 %v1541_v27, %v1532_v25 }
 0x2fd   : > { %v1520_v24 = vpop.f32.mrf.mxu2 }
 0x2fe   : > { %v1553_v30 = vrot.slane %v1551_v28, 4  ;;  %v1543_v31 = vrot.slane %v1542_v29, 2 }
 0x300   : > { %v1554_v32 = vadd.f32 %v1553_v30, %v1551_v28  ;;  %v1544_v33 = vadd.f32 %v1543_v31, %v1542_v29 }
 0x302   : > { %v1555_v34 = vrot.slane %v1554_v32, 2  ;;  %v1545_v35 = vrot.slane %v1544_v33, 1 }
 0x304   : > { %v1556_v36 = vadd.f32 %v1555_v34, %v1554_v32  ;;  %v1546_v37 = vadd.f32 %v1545_v35, %v1544_v33  ;;  %v1657_v32 = vperm.slane %v1652_v13, 3 }
 0x306   : > { %v1557_v39 = vrot.slane %v1556_v36, 1  ;;  %v1548_v40 = vmul.f32 %v1546_v37, %v2615_v61 }
 0x308   : > { %v1558_v41 = vadd.f32 %v1557_v39, %v1556_v36  ;;  %v1550_v42 = vsub.f32 %v1532_v25, %v1548_v40 }
 0x30a   : > { %v1565_v44 = vmul.f32 %v1558_v41, %v2615_v61  ;;  %v1552_v45 = vmul.f32 %v1550_v42, %v1550_v42 }
 0x30c   : > { %v1567_v46 = vadd.f32 1e-05, %v1565_v44  ;;  %v1559_v47 = vrot.slane %v1552_v45, 4  ;;  %v1659_v44 = vperm.slane %v1652_v13, 5 }
 0x30e   : > { %2344 = vrsqrt.f32 %v1567_v46  ;;  %v1560_v48 = vadd.f32 %v1559_v47, %v1552_v45  ;;  %vm1575_vm1 = vweird.f32 %v1567_v46 }
 0x310   : > { %v1561_v49 = vrot.slane %v1560_v48, 2 }
 0x312   : > { %v1562_v50 = vadd.f32 %v1561_v49, %v1560_v48 }
 0x314   : > { %v2345_v51 = vpop.eup %2344  ;;  %v1563_v52 = vrot.slane %v1562_v50, 1 }
 0x315   : > { %v1570_v53 = vmul.f32 %v2345_v51, %v1567_v46  ;;  %vm1576_vm0 = vweird.f32 %v2345_v51 }
 0x316   : > { %v1564_v54 = vadd.f32 %v1563_v52, %v1562_v50  ;;  %vm1577_vm2 = vmor %vm1575_vm1, %vm1576_vm0 }
 0x317   : > { %v1571_v55 = vmul.f32 %v2345_v51, %v1570_v53  ;;  %v2335_v53 = vld [vmem:[#allocation6] ss:$0 sm:$0xff] }
 0x318   : > { %v1566_v56 = vmul.f32 %v1564_v54, %v2615_v61 }
 0x319   : > { %v1572_v57 = vmul.f32 0.5, %v1571_v55 }
 0x31a   : > { %v1568_v58 = vadd.f32 1e-05, %v1566_v56 }
 0x31b   : > { %v1573_v59 = vsub.f32 1.5, %v1572_v57 }
 0x31c   : > { %2346 = vrsqrt.f32 %v1568_v58  ;;  %vm1585_vm5 = vweird.f32 %v1568_v58 }
 0x31d   : > { %v1574_v43 = vmul.f32 %v2345_v51, %v1573_v59 }
 0x31f   : > { %v1578_v60 = vsel %vm1577_vm2, %v2345_v51, %v1574_v43 }
 0x320   : > { %v1589_v62 = vmul.f32 %v1578_v60, %v1549_v26 }
 0x322   : > { %v2347_v63 = vpop.eup %2346  ;;  %vm1591_vm3 = vcmp.ge.f32.partialorder %v1589_v62, 0.0  ;;  %v1593_v1 = vmul.f32 0.2, %v1589_v62 }
 0x323   : > { %v1580_v17 = vmul.f32 %v2347_v63, %v1568_v58  ;;  %vm1586_vm4 = vweird.f32 %v2347_v63 }
 0x324   : > { %v1595_v2 = vsel %vm1591_vm3, %v1589_v62, %v1593_v1  ;;  %vm1587_vm6 = vmor %vm1585_vm5, %vm1586_vm4 }
 0x325   : > { %v1608_v3 = vrot.slane %v1595_v2, 7  ;;  %v1581_v4 = vmul.f32 %v2347_v63, %v1580_v17 }
 0x327   : > { %1612 = vst [vmem:[#allocation5] sm:$0xfe] %v1608_v3  ;;  %v1582_v5 = vmul.f32 0.5, %v1581_v4 }
 0x328   : > { %1614 = vst [vmem:[#allocation5 + $0x10] sm:$0x1] %v1608_v3 }
 0x329   : > { %v1583_v61 = vsub.f32 1.5, %v1582_v5 }
 0x32b   : > { %v1584_v6 = vmul.f32 %v2347_v63, %v1583_v61 }
 0x32d   : > { %v1588_v7 = vsel %vm1587_vm6, %v2347_v63, %v1584_v6 }
 0x32e   : > { %v1590_v8 = vmul.f32 %v1588_v7, %v1550_v42  ;;  %v1618_v0 = vld [vmem:[#allocation5] sm:$0xfe] }
 0x32f   : > { %v1620_v12 = vld [vmem:[#allocation5 + $0x10] sm:$0x1]  ;;  %v1622_v14 = vld [vmem:[#allocation5] sm:$0xfc]  ;;  %v1631_v15 = vrot.slane %v1618_v0, 1 }
 0x330   : > { %vm1592_vm7 = vcmp.ge.f32.partialorder %v1590_v8, 0.0  ;;  %v1594_v9 = vmul.f32 0.2, %v1590_v8  ;;  %v1632_v16 = vrot.slane %v1620_v12, 1  ;;  %v1624_v18 = vld [vmem:[#allocation5 + $0x10] sm:$0x3] }
 0x331   : > { %v1616_v21 = vld [vmem:[#allocation5] sm:$0xff]  ;;  %v1644_v22 = vrot.slane %v1622_v14, 2  ;;  %v1645_v29 = vrot.slane %v1624_v18, 2 }
 0x332   : > { %v1596_v10 = vsel %vm1592_vm7, %v1590_v8, %v1594_v9  ;;  %v1633_v28 = vsel %vm1630_vm8, %v1631_v15, %v1632_v16  ;;  %v1666_v33 = vmul.f32 %v1654_v19, %v1616_v21 }
 0x333   : > { %v1609_v11 = vrot.slane %v1596_v10, 7  ;;  %v1668_v39 = vmul.f32 %v1656_v23, %v1633_v28  ;;  %v1646_v42 = vsel %vm1643_vm9, %v1644_v22, %v1645_v29 }
 0x334   : > { %v1670_v48 = vmul.f32 %v1658_v38, %v1646_v42 }
 0x335   : > { %1613 = vst [vmem:[#allocation5 + $0x8] sm:$0xfe] %v1609_v11 }
 0x336   : > { %1615 = vst [vmem:[#allocation5 + $0x18] sm:$0x1] %v1609_v11 }
 0x33c   : > { %v1617_v25 = vld [vmem:[#allocation5 + $0x8] sm:$0xff] }
 0x33d   : > { %v1619_v26 = vld [vmem:[#allocation5 + $0x8] sm:$0xfe]  ;;  %v1621_v24 = vld [vmem:[#allocation5 + $0x18] sm:$0x1]  ;;  %v1667_v34 = vmul.f32 %v1655_v20, %v1617_v25 }
 0x33e   : > { %v1623_v27 = vld [vmem:[#allocation5 + $0x8] sm:$0xfc]  ;;  %v1625_v30 = vld [vmem:[#allocation5 + $0x18] sm:$0x3]  ;;  %v1634_v31 = vrot.slane %v1619_v26, 1  ;;  %v1635_v35 = vrot.slane %v1621_v24, 1 }
 0x33f   : > { %v1647_v36 = vrot.slane %v1623_v27, 2  ;;  %v1648_v37 = vrot.slane %v1625_v30, 2  ;;  %v1672_v40 = vadd.f32 %v1667_v34, %v1666_v33 }
 0x340   : > { %v1636_v41 = vsel %vm1630_vm8, %v1634_v31, %v1635_v35 }
 0x341   : > { %v1669_v45 = vmul.f32 %v1657_v32, %v1636_v41  ;;  %v1673_v46 = vadd.f32 %v1672_v40, %v1668_v39  ;;  %v1649_v47 = vsel %vm1643_vm9, %v1647_v36, %v1648_v37 }
 0x342   : > { %v1671_v50 = vmul.f32 %v1659_v44, %v1649_v47 }
 0x343   : > { %v1674_v49 = vadd.f32 %v1673_v46, %v1669_v45 }
 0x345   : > { %v1675_v51 = vadd.f32 %v1674_v49, %v1670_v48 }
 0x347   : > { %v1676_v52 = vadd.f32 %v1675_v51, %v1671_v50 }
 0x349   : > { %1677 = vadd.xlane.f32.xlu0 %v1676_v52 }
 0x3bc   : > { %v1678_v54 = vpop.xlane.xlu0 %1677 }
 0x3bd   : > { %v1683_v55 = vadd.f32 %v2335_v53, %v1678_v54 }
 0x3bf   : > { %v1684_v56 = vsub.f32 0.0, %v1683_v55 }
 0x3c1   : > { %v1685_v57 = vmul.f32 1.442695, %v1684_v56 }
 0x3c3   : > { %2348 = vpow2.f32 %v1685_v57 }
 0x3c9   : > { %v2349_v58 = vpop.eup %2348 }
 0x3ca   : > { %v1687_v59 = vadd.f32 1.0, %v2349_v58 }
 0x3cc   : > { %2350 = vrcp.f32 %v1687_v59 }
 0x3d2   : > { %v2351_v43 = vpop.eup %2350 }
 0x3d3   : > { %1690 = vst.msk [vmem:[%s436_s23] sm:$0xff] %vm1689_vm10, %v2351_v43 }
 0x3d4 PF: > { %s25_s19 = sadd.s32 1, %s2456_s19  }
 0x3d5   : > { %p22_p7 = scmp.ge.s32.totalorder %s25_s19, 4  }
 0x3d7   :  { %24 = sbr.rel (!%p22_p7) target bundleno = 5 (0x5), region = 126 }
 0x3dc   :  { %1710 = vsyncpa [#allocation8], 1 }
 0x3dd   :  { %1712 = vsyncpa [#allocation8 + $0x1], 1 }
 0x3de   :  { %1713 = vsyncpa [#allocation10], 1 }

</bundles_post_ra>
